<compile_context>
chip_gen: v7x
topology: tpu7x:2x2x1
jax: 0.10.0
libtpu: 0.0.40
codegen_flags: <defaults>
</compile_context>

<pallas_src>
import jax
import jax.numpy as jnp
from jax.experimental import pallas as pl
from jax.experimental.pallas import tpu as pltpu


# ----------------------------------------------------------------------------
# Fused kernel: 2-layer bi-LSTM (masked sequences) + linear heads + KL loss.
# ----------------------------------------------------------------------------
def _encoder_kernel(x_ref, m_ref,
                    w0f_ref, w0b_ref, whh0_ref, b0_ref,
                    w1f_ref, w1b_ref, whh1_ref, b1_ref,
                    whead_ref, bhead_ref,
                    z_ref, kl_ref,
                    seq_scr, feat_scr):
    f32 = jnp.float32
    TB, twoHd = m_ref.shape          # T*B, 2*Hd
    B = z_ref.shape[0]
    T = TB // B
    Hd = twoHd // 2
    H = 4 * Hd                        # HIDDEN_SIZE of the module

    x = x_ref[...]                    # (T*B, E) time-major flattened embeddings
    mask = m_ref[...]                 # (T*B, 2*Hd): [:, :Hd]=mask[t], [:, Hd:]=mask[T-1-t]

    def lstm_step(gin, m, h, c, whh):
        # one MXU matmul per step covers both directions (block-diag whh)
        gates = gin + jnp.dot(h, whh, preferred_element_type=f32)   # (B, 8*Hd)
        i_g = jax.nn.sigmoid(gates[:, 0 * twoHd:1 * twoHd])
        f_g = jax.nn.sigmoid(gates[:, 1 * twoHd:2 * twoHd])
        g_g = jnp.tanh(gates[:, 2 * twoHd:3 * twoHd])
        o_g = jax.nn.sigmoid(gates[:, 3 * twoHd:4 * twoHd])
        c_new = f_g * c + i_g * g_g
        h_new = o_g * jnp.tanh(c_new)
        # masked update == pack_sequence semantics (state carried past seq end)
        h_upd = h + m * (h_new - h)
        c_upd = c + m * (c_new - c)
        return h_upd, c_upd

    # ----------------------- layer 0 (fwd + bwd fused) -----------------------
    # hoisted input projections: one batched matmul per direction
    g0f = jnp.dot(x, w0f_ref[...], preferred_element_type=f32)   # fwd gate cols
    g0b = jnp.dot(x, w0b_ref[...], preferred_element_type=f32)   # bwd gate cols
    b0 = b0_ref[...]
    whh0 = whh0_ref[...]

    h = jnp.zeros((B, twoHd), f32)
    c = jnp.zeros((B, twoHd), f32)
    for s in range(T):                                  # fully unrolled (T small)
        rf = slice(s * B, (s + 1) * B)                  # fwd processes time s
        rb = slice((T - 1 - s) * B, (T - s) * B)        # bwd processes time T-1-s
        gin = g0f[rf] + g0b[rb] + b0
        h, c = lstm_step(gin, mask[rf], h, c, whh0)
        # stash layer-0 output sequence ([fwd | bwd] per time step) for layer 1
        seq_scr[rf, 0:Hd] = h[:, 0:Hd]
        seq_scr[rb, Hd:twoHd] = h[:, Hd:twoHd]
    h0, c0 = h, c                                       # final (l0 fwd | l0 bwd)

    # ----------------------- layer 1 (fwd + bwd fused) -----------------------
    in1 = seq_scr[...]                                  # (T*B, 2*Hd)
    g1f = jnp.dot(in1, w1f_ref[...], preferred_element_type=f32)
    g1b = jnp.dot(in1, w1b_ref[...], preferred_element_type=f32)
    b1 = b1_ref[...]
    whh1 = whh1_ref[...]

    h = jnp.zeros((B, twoHd), f32)
    c = jnp.zeros((B, twoHd), f32)
    for s in range(T):
        rf = slice(s * B, (s + 1) * B)
        rb = slice((T - 1 - s) * B, (T - s) * B)
        gin = g1f[rf] + g1b[rb] + b1
        h, c = lstm_step(gin, mask[rf], h, c, whh1)
    h1, c1 = h, c                                       # final (l1 fwd | l1 bwd)

    # ------------------------------- head ------------------------------------
    # feature = torch.cat([hidden.view(B,-1), cell.view(B,-1)], -1) where
    # hidden/cell are (4, B, Hd) contiguous; the raw row-major reshape
    # interleaves (layer, direction) with batch -> replicated exactly via
    # static placements into a (B, 2H) VMEM tile.
    for i_flat in range(4 * B):
        d, b = i_flat // B, i_flat % B        # d: [l0 fwd, l0 bwd, l1 fwd, l1 bwd]
        r, q = i_flat // 4, i_flat % 4        # destination row / Hd-column block
        hsrc = (h0 if d < 2 else h1)[b:b + 1, (d % 2) * Hd:(d % 2 + 1) * Hd]
        csrc = (c0 if d < 2 else c1)[b:b + 1, (d % 2) * Hd:(d % 2 + 1) * Hd]
        feat_scr[r:r + 1, q * Hd:(q + 1) * Hd] = hsrc
        feat_scr[r:r + 1, H + q * Hd:H + (q + 1) * Hd] = csrc

    feat = feat_scr[...]                                 # (B, 2H)
    zall = jnp.dot(feat, whead_ref[...], preferred_element_type=f32) + bhead_ref[...]
    two_l = zall.shape[1] // 2
    mu = zall[:, :two_l]
    lv = zall[:, two_l:]
    # TODO(synk): training-mode reparameterization noise (eps ~ N(0,1)) is not
    # sampled; this implements the eval path z = mu.
    z_ref[...] = mu
    kl = 0.5 * jnp.sum(jnp.exp(lv) - lv - 1.0 + mu * mu)
    kl_ref[...] = kl * jnp.ones((1, 1), f32)


# ----------------------------------------------------------------------------
# Wrapper + weight packing
# ----------------------------------------------------------------------------
def _vmem():
    return pl.BlockSpec(memory_space=pltpu.MemorySpace.VMEM)


def _place_gates(w_t, Hd, direction):
    """w_t: (D, 4*Hd) with torch gate blocks [i|f|g|o]; scatter into the
    interleaved (D, 8*Hd) layout [i_f i_b | f_f f_b | g_f g_b | o_f o_b]."""
    D = w_t.shape[0]
    out = jnp.zeros((D, 8 * Hd), jnp.float32)
    for k in range(4):
        lo = k * 2 * Hd + direction * Hd
        out = out.at[:, lo:lo + Hd].set(w_t[:, k * Hd:(k + 1) * Hd])
    return out


def pack_lstm_layer(p_fwd, p_bwd, Hd):
    """p_* = dict(wih=(4Hd, D_in), whh=(4Hd, Hd), bih=(4Hd,), bhh=(4Hd,)),
    PyTorch nn.LSTM layout with gate order (i, f, g, o)."""
    wf = _place_gates(p_fwd["wih"].T, Hd, 0)
    wb = _place_gates(p_bwd["wih"].T, Hd, 1)
    whh = jnp.concatenate([_place_gates(p_fwd["whh"].T, Hd, 0),
                           _place_gates(p_bwd["whh"].T, Hd, 1)], axis=0)
    b = (_place_gates((p_fwd["bih"] + p_fwd["bhh"])[None, :], Hd, 0)
         + _place_gates((p_bwd["bih"] + p_bwd["bhh"])[None, :], Hd, 1))
    return wf, wb, whh, b


def tree_seq_rnn_encoder_forward(x_pad, mask, packed):
    T, B, E = x_pad.shape
    Hd = packed["whh0"].shape[0] // 2
    four_l = packed["whead"].shape[1]                   # 4 * LATENT_DIM

    x2d = x_pad.reshape(T * B, E)
    # fused fwd/bwd mask: columns [:Hd] gate time t, [Hd:] gate time T-1-t
    mcat = jnp.concatenate(
        [jnp.broadcast_to(mask[:, :, None], (T, B, Hd)),
         jnp.broadcast_to(mask[::-1][:, :, None], (T, B, Hd))],
        axis=-1).reshape(T * B, 2 * Hd).astype(jnp.float32)

    ins = (x2d, mcat,
           packed["w0f"], packed["w0b"], packed["whh0"], packed["b0"],
           packed["w1f"], packed["w1b"], packed["whh1"], packed["b1"],
           packed["whead"], packed["bhead"])
    z, kl = pl.pallas_call(
        _encoder_kernel,
        out_shape=(jax.ShapeDtypeStruct((B, four_l // 2), jnp.float32),
                   jax.ShapeDtypeStruct((1, 1), jnp.float32)),
        in_specs=[_vmem() for _ in ins],
        out_specs=(_vmem(), _vmem()),
        scratch_shapes=[pltpu.VMEM((T * B, 2 * Hd), jnp.float32),  # layer-0 outputs
                        pltpu.VMEM((B, 8 * Hd), jnp.float32)],     # head feature
    )(*ins)
    return z, kl[0, 0]


# ----------------------------------------------------------------------------
# Main
# ----------------------------------------------------------------------------
if __name__ == "__main__":
    E, H, L = 16, 32, 8            # EMBEDDING_DIM, HIDDEN_SIZE, LATENT_DIM
    Hd = H // 4                    # per-direction LSTM hidden size
    tree_sizes = [8, 5]
    B = len(tree_sizes)
    T = max(tree_sizes)
    N = sum(tree_sizes)
    VOCAB = 20

    key = jax.random.PRNGKey(0)
    keys = jax.random.split(key, 8)

    # two embedding tables (two vocab streams, like the module's embedding_layers dict)
    emb0 = jax.random.normal(keys[0], (VOCAB, E), jnp.float32)
    emb1 = jax.random.normal(keys[1], (VOCAB, E), jnp.float32)
    tokens = jax.random.randint(keys[2], (N,), 0, VOCAB)
    vocab_ids = jax.random.randint(keys[3], (N,), 0, 2)

    # glue: per-node embedding lookup routed by vocab id
    # (torch: features[vocabs == k] = embedding_layer_k(features[vocabs == k]))
    features = jnp.where((vocab_ids == 0)[:, None], emb0[tokens], emb1[tokens]).astype(jnp.float32)

    # glue: pack_sequence equivalent -> time-major padded batch + validity mask
    x_pad = jnp.zeros((T, B, E), jnp.float32)
    off = 0
    for b, sz in enumerate(tree_sizes):
        x_pad = x_pad.at[:sz, b, :].set(features[off:off + sz])
        off += sz
    mask = (jnp.arange(T)[:, None] < jnp.asarray(tree_sizes)[None, :]).astype(jnp.float32)

    # PyTorch-layout parameters (uniform +-1/sqrt(fan)), then lane-packed.
    kit = iter(jax.random.split(keys[4], 64))
    lstm_bound = 1.0 / (Hd ** 0.5)

    def u(shape, bound):
        return jax.random.uniform(next(kit), shape, jnp.float32, -bound, bound)

    def lstm_dir_params(d_in):
        return dict(wih=u((4 * Hd, d_in), lstm_bound), whh=u((4 * Hd, Hd), lstm_bound),
                    bih=u((4 * Hd,), lstm_bound), bhh=u((4 * Hd,), lstm_bound))

    l0f, l0b = lstm_dir_params(E), lstm_dir_params(E)
    l1f, l1b = lstm_dir_params(2 * Hd), lstm_dir_params(2 * Hd)

    lin_bound = 1.0 / ((2 * H) ** 0.5)
    wzm, bzm = u((2 * L, 2 * H), lin_bound), u((2 * L,), lin_bound)
    wzlv, bzlv = u((2 * L, 2 * H), lin_bound), u((2 * L,), lin_bound)

    w0f, w0b, whh0, b0 = pack_lstm_layer(l0f, l0b, Hd)
    w1f, w1b, whh1, b1 = pack_lstm_layer(l1f, l1b, Hd)
    packed = dict(
        w0f=w0f, w0b=w0b, whh0=whh0, b0=b0,
        w1f=w1f, w1b=w1b, whh1=whh1, b1=b1,
        whead=jnp.concatenate([wzm.T, wzlv.T], axis=1),   # (2H, 4L): [z_mean | z_log_var]
        bhead=jnp.concatenate([bzm, bzlv])[None, :],      # (1, 4L)
    )

    z, kl_loss = tree_seq_rnn_encoder_forward(x_pad, mask, packed)
    jax.block_until_ready((z, kl_loss))
    assert z.shape == (B, 2 * L) and kl_loss.shape == ()
    print("KERNEL_OK")
</pallas_src>

<mosaic_0001>
module attributes {stable_mosaic.version = 11 : i64} {
  func.func @_encoder_kernel(%arg0: memref<16x16xf32, #tpu.memory_space<vmem>>, %arg1: memref<16x16xf32, #tpu.memory_space<vmem>>, %arg2: memref<16x64xf32, #tpu.memory_space<vmem>>, %arg3: memref<16x64xf32, #tpu.memory_space<vmem>>, %arg4: memref<16x64xf32, #tpu.memory_space<vmem>>, %arg5: memref<1x64xf32, #tpu.memory_space<vmem>>, %arg6: memref<16x64xf32, #tpu.memory_space<vmem>>, %arg7: memref<16x64xf32, #tpu.memory_space<vmem>>, %arg8: memref<16x64xf32, #tpu.memory_space<vmem>>, %arg9: memref<1x64xf32, #tpu.memory_space<vmem>>, %arg10: memref<64x32xf32, #tpu.memory_space<vmem>>, %arg11: memref<1x32xf32, #tpu.memory_space<vmem>>, %arg12: memref<2x16xf32, #tpu.memory_space<vmem>>, %arg13: memref<1x1xf32, #tpu.memory_space<vmem>>, %arg14: memref<16x16xf32, #tpu.memory_space<vmem>>, %arg15: memref<2x64xf32, #tpu.memory_space<vmem>>) attributes {dimension_semantics = [], scalar_prefetch = 0 : i64, scratch_operands = 2 : i64, tpu.core_type = #tpu.core_type<tc>} {
    %c0 = arith.constant 0 : index
    %c0_0 = arith.constant 0 : index
    %0 = vector.load %arg0[%c0, %c0_0] : memref<16x16xf32, #tpu.memory_space<vmem>>, vector<16x16xf32>
    %c0_1 = arith.constant 0 : index
    %c0_2 = arith.constant 0 : index
    %1 = vector.load %arg1[%c0_1, %c0_2] : memref<16x16xf32, #tpu.memory_space<vmem>>, vector<16x16xf32>
    %c0_3 = arith.constant 0 : index
    %c0_4 = arith.constant 0 : index
    %2 = vector.load %arg2[%c0_3, %c0_4] : memref<16x64xf32, #tpu.memory_space<vmem>>, vector<16x64xf32>
    %cst = arith.constant dense<0.000000e+00> : vector<16x64xf32>
    %3 = tpu.matmul %0, %2, %cst {dimension_numbers = #tpu.dot_dimension_numbers<[1], [0], [0], [1], [0, 0, 1, 1], [], []>} : vector<16x16xf32>, vector<16x64xf32>, vector<16x64xf32> -> vector<16x64xf32>
    %c0_5 = arith.constant 0 : index
    %c0_6 = arith.constant 0 : index
    %4 = vector.load %arg3[%c0_5, %c0_6] : memref<16x64xf32, #tpu.memory_space<vmem>>, vector<16x64xf32>
    %cst_7 = arith.constant dense<0.000000e+00> : vector<16x64xf32>
    %5 = tpu.matmul %0, %4, %cst_7 {dimension_numbers = #tpu.dot_dimension_numbers<[1], [0], [0], [1], [0, 0, 1, 1], [], []>} : vector<16x16xf32>, vector<16x64xf32>, vector<16x64xf32> -> vector<16x64xf32>
    %c0_8 = arith.constant 0 : index
    %c0_9 = arith.constant 0 : index
    %6 = vector.load %arg5[%c0_8, %c0_9] : memref<1x64xf32, #tpu.memory_space<vmem>>, vector<1x64xf32>
    %c0_10 = arith.constant 0 : index
    %c0_11 = arith.constant 0 : index
    %7 = vector.load %arg4[%c0_10, %c0_11] : memref<16x64xf32, #tpu.memory_space<vmem>>, vector<16x64xf32>
    %cst_12 = arith.constant 0.000000e+00 : f32
    %8 = vector.broadcast %cst_12 : f32 to vector<2x16xf32>
    %cst_13 = arith.constant 0.000000e+00 : f32
    %9 = vector.broadcast %cst_13 : f32 to vector<2x16xf32>
    %10 = vector.extract_strided_slice %3 {offsets = [0, 0], sizes = [2, 64], strides = [1, 1]} : vector<16x64xf32> to vector<2x64xf32>
    %11 = vector.extract_strided_slice %5 {offsets = [14, 0], sizes = [2, 64], strides = [1, 1]} : vector<16x64xf32> to vector<2x64xf32>
    %12 = arith.addf %10, %11 : vector<2x64xf32>
    %13 = vector.broadcast %6 : vector<1x64xf32> to vector<2x64xf32>
    %14 = arith.addf %12, %13 : vector<2x64xf32>
    %15 = vector.extract_strided_slice %1 {offsets = [0, 0], sizes = [2, 16], strides = [1, 1]} : vector<16x16xf32> to vector<2x16xf32>
    %cst_14 = arith.constant dense<0.000000e+00> : vector<2x64xf32>
    %16 = tpu.matmul %8, %7, %cst_14 {dimension_numbers = #tpu.dot_dimension_numbers<[1], [0], [0], [1], [0, 0, 1, 1], [], []>} : vector<2x16xf32>, vector<16x64xf32>, vector<2x64xf32> -> vector<2x64xf32>
    %17 = arith.addf %14, %16 : vector<2x64xf32>
    %18 = vector.extract_strided_slice %17 {offsets = [0, 0], sizes = [2, 16], strides = [1, 1]} : vector<2x64xf32> to vector<2x16xf32>
    %19 = arith.negf %18 : vector<2x16xf32>
    %20 = math.exp %19 : vector<2x16xf32>
    %cst_15 = arith.constant 1.000000e+00 : f32
    %21 = vector.broadcast %cst_15 : f32 to vector<2x16xf32>
    %22 = arith.addf %21, %20 : vector<2x16xf32>
    %23 = arith.divf %21, %22 : vector<2x16xf32>
    %24 = vector.extract_strided_slice %17 {offsets = [0, 16], sizes = [2, 16], strides = [1, 1]} : vector<2x64xf32> to vector<2x16xf32>
    %25 = arith.negf %24 : vector<2x16xf32>
    %26 = math.exp %25 : vector<2x16xf32>
    %cst_16 = arith.constant 1.000000e+00 : f32
    %27 = vector.broadcast %cst_16 : f32 to vector<2x16xf32>
    %28 = arith.addf %27, %26 : vector<2x16xf32>
    %29 = arith.divf %27, %28 : vector<2x16xf32>
    %30 = vector.extract_strided_slice %17 {offsets = [0, 32], sizes = [2, 16], strides = [1, 1]} : vector<2x64xf32> to vector<2x16xf32>
    %31 = math.tanh %30 : vector<2x16xf32>
    %32 = vector.extract_strided_slice %17 {offsets = [0, 48], sizes = [2, 16], strides = [1, 1]} : vector<2x64xf32> to vector<2x16xf32>
    %33 = arith.negf %32 : vector<2x16xf32>
    %34 = math.exp %33 : vector<2x16xf32>
    %cst_17 = arith.constant 1.000000e+00 : f32
    %35 = vector.broadcast %cst_17 : f32 to vector<2x16xf32>
    %36 = arith.addf %35, %34 : vector<2x16xf32>
    %37 = arith.divf %35, %36 : vector<2x16xf32>
    %38 = arith.mulf %29, %9 : vector<2x16xf32>
    %39 = arith.mulf %23, %31 : vector<2x16xf32>
    %40 = arith.addf %38, %39 : vector<2x16xf32>
    %41 = math.tanh %40 : vector<2x16xf32>
    %42 = arith.mulf %37, %41 : vector<2x16xf32>
    %43 = arith.subf %42, %8 : vector<2x16xf32>
    %44 = arith.mulf %15, %43 : vector<2x16xf32>
    %45 = arith.addf %8, %44 : vector<2x16xf32>
    %46 = arith.subf %40, %9 : vector<2x16xf32>
    %47 = arith.mulf %15, %46 : vector<2x16xf32>
    %48 = arith.addf %9, %47 : vector<2x16xf32>
    %49 = vector.extract_strided_slice %45 {offsets = [0, 0], sizes = [2, 8], strides = [1, 1]} : vector<2x16xf32> to vector<2x8xf32>
    %c0_18 = arith.constant 0 : index
    %c0_19 = arith.constant 0 : index
    %50 = vector.load %arg14[%c0_18, %c0_19] : memref<16x16xf32, #tpu.memory_space<vmem>>, vector<2x8xf32>
    tpu.vector_store %arg14[%c0_18, %c0_19], %49 {strides = array<i32>} : memref<16x16xf32, #tpu.memory_space<vmem>>, vector<2x8xf32>,
    %51 = vector.extract_strided_slice %45 {offsets = [0, 8], sizes = [2, 8], strides = [1, 1]} : vector<2x16xf32> to vector<2x8xf32>
    %c14 = arith.constant 14 : index
    %c8 = arith.constant 8 : index
    %52 = vector.load %arg14[%c14, %c8] : memref<16x16xf32, #tpu.memory_space<vmem>>, vector<2x8xf32>
    tpu.vector_store %arg14[%c14, %c8], %51 {strides = array<i32>} : memref<16x16xf32, #tpu.memory_space<vmem>>, vector<2x8xf32>,
    %53 = vector.extract_strided_slice %3 {offsets = [2, 0], sizes = [2, 64], strides = [1, 1]} : vector<16x64xf32> to vector<2x64xf32>
    %54 = vector.extract_strided_slice %5 {offsets = [12, 0], sizes = [2, 64], strides = [1, 1]} : vector<16x64xf32> to vector<2x64xf32>
    %55 = arith.addf %53, %54 : vector<2x64xf32>
    %56 = vector.broadcast %6 : vector<1x64xf32> to vector<2x64xf32>
    %57 = arith.addf %55, %56 : vector<2x64xf32>
    %58 = vector.extract_strided_slice %1 {offsets = [2, 0], sizes = [2, 16], strides = [1, 1]} : vector<16x16xf32> to vector<2x16xf32>
    %cst_20 = arith.constant dense<0.000000e+00> : vector<2x64xf32>
    %59 = tpu.matmul %45, %7, %cst_20 {dimension_numbers = #tpu.dot_dimension_numbers<[1], [0], [0], [1], [0, 0, 1, 1], [], []>} : vector<2x16xf32>, vector<16x64xf32>, vector<2x64xf32> -> vector<2x64xf32>
    %60 = arith.addf %57, %59 : vector<2x64xf32>
    %61 = vector.extract_strided_slice %60 {offsets = [0, 0], sizes = [2, 16], strides = [1, 1]} : vector<2x64xf32> to vector<2x16xf32>
    %62 = arith.negf %61 : vector<2x16xf32>
    %63 = math.exp %62 : vector<2x16xf32>
    %cst_21 = arith.constant 1.000000e+00 : f32
    %64 = vector.broadcast %cst_21 : f32 to vector<2x16xf32>
    %65 = arith.addf %64, %63 : vector<2x16xf32>
    %66 = arith.divf %64, %65 : vector<2x16xf32>
    %67 = vector.extract_strided_slice %60 {offsets = [0, 16], sizes = [2, 16], strides = [1, 1]} : vector<2x64xf32> to vector<2x16xf32>
    %68 = arith.negf %67 : vector<2x16xf32>
    %69 = math.exp %68 : vector<2x16xf32>
    %cst_22 = arith.constant 1.000000e+00 : f32
    %70 = vector.broadcast %cst_22 : f32 to vector<2x16xf32>
    %71 = arith.addf %70, %69 : vector<2x16xf32>
    %72 = arith.divf %70, %71 : vector<2x16xf32>
    %73 = vector.extract_strided_slice %60 {offsets = [0, 32], sizes = [2, 16], strides = [1, 1]} : vector<2x64xf32> to vector<2x16xf32>
    %74 = math.tanh %73 : vector<2x16xf32>
    %75 = vector.extract_strided_slice %60 {offsets = [0, 48], sizes = [2, 16], strides = [1, 1]} : vector<2x64xf32> to vector<2x16xf32>
    %76 = arith.negf %75 : vector<2x16xf32>
    %77 = math.exp %76 : vector<2x16xf32>
    %cst_23 = arith.constant 1.000000e+00 : f32
    %78 = vector.broadcast %cst_23 : f32 to vector<2x16xf32>
    %79 = arith.addf %78, %77 : vector<2x16xf32>
    %80 = arith.divf %78, %79 : vector<2x16xf32>
    %81 = arith.mulf %72, %48 : vector<2x16xf32>
    %82 = arith.mulf %66, %74 : vector<2x16xf32>
    %83 = arith.addf %81, %82 : vector<2x16xf32>
    %84 = math.tanh %83 : vector<2x16xf32>
    %85 = arith.mulf %80, %84 : vector<2x16xf32>
    %86 = arith.subf %85, %45 : vector<2x16xf32>
    %87 = arith.mulf %58, %86 : vector<2x16xf32>
    %88 = arith.addf %45, %87 : vector<2x16xf32>
    %89 = arith.subf %83, %48 : vector<2x16xf32>
    %90 = arith.mulf %58, %89 : vector<2x16xf32>
    %91 = arith.addf %48, %90 : vector<2x16xf32>
    %92 = vector.extract_strided_slice %88 {offsets = [0, 0], sizes = [2, 8], strides = [1, 1]} : vector<2x16xf32> to vector<2x8xf32>
    %c2 = arith.constant 2 : index
    %c0_24 = arith.constant 0 : index
    %93 = vector.load %arg14[%c2, %c0_24] : memref<16x16xf32, #tpu.memory_space<vmem>>, vector<2x8xf32>
    tpu.vector_store %arg14[%c2, %c0_24], %92 {strides = array<i32>} : memref<16x16xf32, #tpu.memory_space<vmem>>, vector<2x8xf32>,
    %94 = vector.extract_strided_slice %88 {offsets = [0, 8], sizes = [2, 8], strides = [1, 1]} : vector<2x16xf32> to vector<2x8xf32>
    %c12 = arith.constant 12 : index
    %c8_25 = arith.constant 8 : index
    %95 = vector.load %arg14[%c12, %c8_25] : memref<16x16xf32, #tpu.memory_space<vmem>>, vector<2x8xf32>
    tpu.vector_store %arg14[%c12, %c8_25], %94 {strides = array<i32>} : memref<16x16xf32, #tpu.memory_space<vmem>>, vector<2x8xf32>,
    %96 = vector.extract_strided_slice %3 {offsets = [4, 0], sizes = [2, 64], strides = [1, 1]} : vector<16x64xf32> to vector<2x64xf32>
    %97 = vector.extract_strided_slice %5 {offsets = [10, 0], sizes = [2, 64], strides = [1, 1]} : vector<16x64xf32> to vector<2x64xf32>
    %98 = arith.addf %96, %97 : vector<2x64xf32>
    %99 = vector.broadcast %6 : vector<1x64xf32> to vector<2x64xf32>
    %100 = arith.addf %98, %99 : vector<2x64xf32>
    %101 = vector.extract_strided_slice %1 {offsets = [4, 0], sizes = [2, 16], strides = [1, 1]} : vector<16x16xf32> to vector<2x16xf32>
    %cst_26 = arith.constant dense<0.000000e+00> : vector<2x64xf32>
    %102 = tpu.matmul %88, %7, %cst_26 {dimension_numbers = #tpu.dot_dimension_numbers<[1], [0], [0], [1], [0, 0, 1, 1], [], []>} : vector<2x16xf32>, vector<16x64xf32>, vector<2x64xf32> -> vector<2x64xf32>
    %103 = arith.addf %100, %102 : vector<2x64xf32>
    %104 = vector.extract_strided_slice %103 {offsets = [0, 0], sizes = [2, 16], strides = [1, 1]} : vector<2x64xf32> to vector<2x16xf32>
    %105 = arith.negf %104 : vector<2x16xf32>
    %106 = math.exp %105 : vector<2x16xf32>
    %cst_27 = arith.constant 1.000000e+00 : f32
    %107 = vector.broadcast %cst_27 : f32 to vector<2x16xf32>
    %108 = arith.addf %107, %106 : vector<2x16xf32>
    %109 = arith.divf %107, %108 : vector<2x16xf32>
    %110 = vector.extract_strided_slice %103 {offsets = [0, 16], sizes = [2, 16], strides = [1, 1]} : vector<2x64xf32> to vector<2x16xf32>
    %111 = arith.negf %110 : vector<2x16xf32>
    %112 = math.exp %111 : vector<2x16xf32>
    %cst_28 = arith.constant 1.000000e+00 : f32
    %113 = vector.broadcast %cst_28 : f32 to vector<2x16xf32>
    %114 = arith.addf %113, %112 : vector<2x16xf32>
    %115 = arith.divf %113, %114 : vector<2x16xf32>
    %116 = vector.extract_strided_slice %103 {offsets = [0, 32], sizes = [2, 16], strides = [1, 1]} : vector<2x64xf32> to vector<2x16xf32>
    %117 = math.tanh %116 : vector<2x16xf32>
    %118 = vector.extract_strided_slice %103 {offsets = [0, 48], sizes = [2, 16], strides = [1, 1]} : vector<2x64xf32> to vector<2x16xf32>
    %119 = arith.negf %118 : vector<2x16xf32>
    %120 = math.exp %119 : vector<2x16xf32>
    %cst_29 = arith.constant 1.000000e+00 : f32
    %121 = vector.broadcast %cst_29 : f32 to vector<2x16xf32>
    %122 = arith.addf %121, %120 : vector<2x16xf32>
    %123 = arith.divf %121, %122 : vector<2x16xf32>
    %124 = arith.mulf %115, %91 : vector<2x16xf32>
    %125 = arith.mulf %109, %117 : vector<2x16xf32>
    %126 = arith.addf %124, %125 : vector<2x16xf32>
    %127 = math.tanh %126 : vector<2x16xf32>
    %128 = arith.mulf %123, %127 : vector<2x16xf32>
    %129 = arith.subf %128, %88 : vector<2x16xf32>
    %130 = arith.mulf %101, %129 : vector<2x16xf32>
    %131 = arith.addf %88, %130 : vector<2x16xf32>
    %132 = arith.subf %126, %91 : vector<2x16xf32>
    %133 = arith.mulf %101, %132 : vector<2x16xf32>
    %134 = arith.addf %91, %133 : vector<2x16xf32>
    %135 = vector.extract_strided_slice %131 {offsets = [0, 0], sizes = [2, 8], strides = [1, 1]} : vector<2x16xf32> to vector<2x8xf32>
    %c4 = arith.constant 4 : index
    %c0_30 = arith.constant 0 : index
    %136 = vector.load %arg14[%c4, %c0_30] : memref<16x16xf32, #tpu.memory_space<vmem>>, vector<2x8xf32>
    tpu.vector_store %arg14[%c4, %c0_30], %135 {strides = array<i32>} : memref<16x16xf32, #tpu.memory_space<vmem>>, vector<2x8xf32>,
    %137 = vector.extract_strided_slice %131 {offsets = [0, 8], sizes = [2, 8], strides = [1, 1]} : vector<2x16xf32> to vector<2x8xf32>
    %c10 = arith.constant 10 : index
    %c8_31 = arith.constant 8 : index
    %138 = vector.load %arg14[%c10, %c8_31] : memref<16x16xf32, #tpu.memory_space<vmem>>, vector<2x8xf32>
    tpu.vector_store %arg14[%c10, %c8_31], %137 {strides = array<i32>} : memref<16x16xf32, #tpu.memory_space<vmem>>, vector<2x8xf32>,
    %139 = vector.extract_strided_slice %3 {offsets = [6, 0], sizes = [2, 64], strides = [1, 1]} : vector<16x64xf32> to vector<2x64xf32>
    %140 = vector.extract_strided_slice %5 {offsets = [8, 0], sizes = [2, 64], strides = [1, 1]} : vector<16x64xf32> to vector<2x64xf32>
    %141 = arith.addf %139, %140 : vector<2x64xf32>
    %142 = vector.broadcast %6 : vector<1x64xf32> to vector<2x64xf32>
    %143 = arith.addf %141, %142 : vector<2x64xf32>
    %144 = vector.extract_strided_slice %1 {offsets = [6, 0], sizes = [2, 16], strides = [1, 1]} : vector<16x16xf32> to vector<2x16xf32>
    %cst_32 = arith.constant dense<0.000000e+00> : vector<2x64xf32>
    %145 = tpu.matmul %131, %7, %cst_32 {dimension_numbers = #tpu.dot_dimension_numbers<[1], [0], [0], [1], [0, 0, 1, 1], [], []>} : vector<2x16xf32>, vector<16x64xf32>, vector<2x64xf32> -> vector<2x64xf32>
    %146 = arith.addf %143, %145 : vector<2x64xf32>
    %147 = vector.extract_strided_slice %146 {offsets = [0, 0], sizes = [2, 16], strides = [1, 1]} : vector<2x64xf32> to vector<2x16xf32>
    %148 = arith.negf %147 : vector<2x16xf32>
    %149 = math.exp %148 : vector<2x16xf32>
    %cst_33 = arith.constant 1.000000e+00 : f32
    %150 = vector.broadcast %cst_33 : f32 to vector<2x16xf32>
    %151 = arith.addf %150, %149 : vector<2x16xf32>
    %152 = arith.divf %150, %151 : vector<2x16xf32>
    %153 = vector.extract_strided_slice %146 {offsets = [0, 16], sizes = [2, 16], strides = [1, 1]} : vector<2x64xf32> to vector<2x16xf32>
    %154 = arith.negf %153 : vector<2x16xf32>
    %155 = math.exp %154 : vector<2x16xf32>
    %cst_34 = arith.constant 1.000000e+00 : f32
    %156 = vector.broadcast %cst_34 : f32 to vector<2x16xf32>
    %157 = arith.addf %156, %155 : vector<2x16xf32>
    %158 = arith.divf %156, %157 : vector<2x16xf32>
    %159 = vector.extract_strided_slice %146 {offsets = [0, 32], sizes = [2, 16], strides = [1, 1]} : vector<2x64xf32> to vector<2x16xf32>
    %160 = math.tanh %159 : vector<2x16xf32>
    %161 = vector.extract_strided_slice %146 {offsets = [0, 48], sizes = [2, 16], strides = [1, 1]} : vector<2x64xf32> to vector<2x16xf32>
    %162 = arith.negf %161 : vector<2x16xf32>
    %163 = math.exp %162 : vector<2x16xf32>
    %cst_35 = arith.constant 1.000000e+00 : f32
    %164 = vector.broadcast %cst_35 : f32 to vector<2x16xf32>
    %165 = arith.addf %164, %163 : vector<2x16xf32>
    %166 = arith.divf %164, %165 : vector<2x16xf32>
    %167 = arith.mulf %158, %134 : vector<2x16xf32>
    %168 = arith.mulf %152, %160 : vector<2x16xf32>
    %169 = arith.addf %167, %168 : vector<2x16xf32>
    %170 = math.tanh %169 : vector<2x16xf32>
    %171 = arith.mulf %166, %170 : vector<2x16xf32>
    %172 = arith.subf %171, %131 : vector<2x16xf32>
    %173 = arith.mulf %144, %172 : vector<2x16xf32>
    %174 = arith.addf %131, %173 : vector<2x16xf32>
    %175 = arith.subf %169, %134 : vector<2x16xf32>
    %176 = arith.mulf %144, %175 : vector<2x16xf32>
    %177 = arith.addf %134, %176 : vector<2x16xf32>
    %178 = vector.extract_strided_slice %174 {offsets = [0, 0], sizes = [2, 8], strides = [1, 1]} : vector<2x16xf32> to vector<2x8xf32>
    %c6 = arith.constant 6 : index
    %c0_36 = arith.constant 0 : index
    %179 = vector.load %arg14[%c6, %c0_36] : memref<16x16xf32, #tpu.memory_space<vmem>>, vector<2x8xf32>
    tpu.vector_store %arg14[%c6, %c0_36], %178 {strides = array<i32>} : memref<16x16xf32, #tpu.memory_space<vmem>>, vector<2x8xf32>,
    %180 = vector.extract_strided_slice %174 {offsets = [0, 8], sizes = [2, 8], strides = [1, 1]} : vector<2x16xf32> to vector<2x8xf32>
    %c8_37 = arith.constant 8 : index
    %c8_38 = arith.constant 8 : index
    %181 = vector.load %arg14[%c8_37, %c8_38] : memref<16x16xf32, #tpu.memory_space<vmem>>, vector<2x8xf32>
    tpu.vector_store %arg14[%c8_37, %c8_38], %180 {strides = array<i32>} : memref<16x16xf32, #tpu.memory_space<vmem>>, vector<2x8xf32>,
    %182 = vector.extract_strided_slice %3 {offsets = [8, 0], sizes = [2, 64], strides = [1, 1]} : vector<16x64xf32> to vector<2x64xf32>
    %183 = vector.extract_strided_slice %5 {offsets = [6, 0], sizes = [2, 64], strides = [1, 1]} : vector<16x64xf32> to vector<2x64xf32>
    %184 = arith.addf %182, %183 : vector<2x64xf32>
    %185 = vector.broadcast %6 : vector<1x64xf32> to vector<2x64xf32>
    %186 = arith.addf %184, %185 : vector<2x64xf32>
    %187 = vector.extract_strided_slice %1 {offsets = [8, 0], sizes = [2, 16], strides = [1, 1]} : vector<16x16xf32> to vector<2x16xf32>
    %cst_39 = arith.constant dense<0.000000e+00> : vector<2x64xf32>
    %188 = tpu.matmul %174, %7, %cst_39 {dimension_numbers = #tpu.dot_dimension_numbers<[1], [0], [0], [1], [0, 0, 1, 1], [], []>} : vector<2x16xf32>, vector<16x64xf32>, vector<2x64xf32> -> vector<2x64xf32>
    %189 = arith.addf %186, %188 : vector<2x64xf32>
    %190 = vector.extract_strided_slice %189 {offsets = [0, 0], sizes = [2, 16], strides = [1, 1]} : vector<2x64xf32> to vector<2x16xf32>
    %191 = arith.negf %190 : vector<2x16xf32>
    %192 = math.exp %191 : vector<2x16xf32>
    %cst_40 = arith.constant 1.000000e+00 : f32
    %193 = vector.broadcast %cst_40 : f32 to vector<2x16xf32>
    %194 = arith.addf %193, %192 : vector<2x16xf32>
    %195 = arith.divf %193, %194 : vector<2x16xf32>
    %196 = vector.extract_strided_slice %189 {offsets = [0, 16], sizes = [2, 16], strides = [1, 1]} : vector<2x64xf32> to vector<2x16xf32>
    %197 = arith.negf %196 : vector<2x16xf32>
    %198 = math.exp %197 : vector<2x16xf32>
    %cst_41 = arith.constant 1.000000e+00 : f32
    %199 = vector.broadcast %cst_41 : f32 to vector<2x16xf32>
    %200 = arith.addf %199, %198 : vector<2x16xf32>
    %201 = arith.divf %199, %200 : vector<2x16xf32>
    %202 = vector.extract_strided_slice %189 {offsets = [0, 32], sizes = [2, 16], strides = [1, 1]} : vector<2x64xf32> to vector<2x16xf32>
    %203 = math.tanh %202 : vector<2x16xf32>
    %204 = vector.extract_strided_slice %189 {offsets = [0, 48], sizes = [2, 16], strides = [1, 1]} : vector<2x64xf32> to vector<2x16xf32>
    %205 = arith.negf %204 : vector<2x16xf32>
    %206 = math.exp %205 : vector<2x16xf32>
    %cst_42 = arith.constant 1.000000e+00 : f32
    %207 = vector.broadcast %cst_42 : f32 to vector<2x16xf32>
    %208 = arith.addf %207, %206 : vector<2x16xf32>
    %209 = arith.divf %207, %208 : vector<2x16xf32>
    %210 = arith.mulf %201, %177 : vector<2x16xf32>
    %211 = arith.mulf %195, %203 : vector<2x16xf32>
    %212 = arith.addf %210, %211 : vector<2x16xf32>
    %213 = math.tanh %212 : vector<2x16xf32>
    %214 = arith.mulf %209, %213 : vector<2x16xf32>
    %215 = arith.subf %214, %174 : vector<2x16xf32>
    %216 = arith.mulf %187, %215 : vector<2x16xf32>
    %217 = arith.addf %174, %216 : vector<2x16xf32>
    %218 = arith.subf %212, %177 : vector<2x16xf32>
    %219 = arith.mulf %187, %218 : vector<2x16xf32>
    %220 = arith.addf %177, %219 : vector<2x16xf32>
    %221 = vector.extract_strided_slice %217 {offsets = [0, 0], sizes = [2, 8], strides = [1, 1]} : vector<2x16xf32> to vector<2x8xf32>
    %c8_43 = arith.constant 8 : index
    %c0_44 = arith.constant 0 : index
    %222 = vector.load %arg14[%c8_43, %c0_44] : memref<16x16xf32, #tpu.memory_space<vmem>>, vector<2x8xf32>
    tpu.vector_store %arg14[%c8_43, %c0_44], %221 {strides = array<i32>} : memref<16x16xf32, #tpu.memory_space<vmem>>, vector<2x8xf32>,
    %223 = vector.extract_strided_slice %217 {offsets = [0, 8], sizes = [2, 8], strides = [1, 1]} : vector<2x16xf32> to vector<2x8xf32>
    %c6_45 = arith.constant 6 : index
    %c8_46 = arith.constant 8 : index
    %224 = vector.load %arg14[%c6_45, %c8_46] : memref<16x16xf32, #tpu.memory_space<vmem>>, vector<2x8xf32>
    tpu.vector_store %arg14[%c6_45, %c8_46], %223 {strides = array<i32>} : memref<16x16xf32, #tpu.memory_space<vmem>>, vector<2x8xf32>,
    %225 = vector.extract_strided_slice %3 {offsets = [10, 0], sizes = [2, 64], strides = [1, 1]} : vector<16x64xf32> to vector<2x64xf32>
    %226 = vector.extract_strided_slice %5 {offsets = [4, 0], sizes = [2, 64], strides = [1, 1]} : vector<16x64xf32> to vector<2x64xf32>
    %227 = arith.addf %225, %226 : vector<2x64xf32>
    %228 = vector.broadcast %6 : vector<1x64xf32> to vector<2x64xf32>
    %229 = arith.addf %227, %228 : vector<2x64xf32>
    %230 = vector.extract_strided_slice %1 {offsets = [10, 0], sizes = [2, 16], strides = [1, 1]} : vector<16x16xf32> to vector<2x16xf32>
    %cst_47 = arith.constant dense<0.000000e+00> : vector<2x64xf32>
    %231 = tpu.matmul %217, %7, %cst_47 {dimension_numbers = #tpu.dot_dimension_numbers<[1], [0], [0], [1], [0, 0, 1, 1], [], []>} : vector<2x16xf32>, vector<16x64xf32>, vector<2x64xf32> -> vector<2x64xf32>
    %232 = arith.addf %229, %231 : vector<2x64xf32>
    %233 = vector.extract_strided_slice %232 {offsets = [0, 0], sizes = [2, 16], strides = [1, 1]} : vector<2x64xf32> to vector<2x16xf32>
    %234 = arith.negf %233 : vector<2x16xf32>
    %235 = math.exp %234 : vector<2x16xf32>
    %cst_48 = arith.constant 1.000000e+00 : f32
    %236 = vector.broadcast %cst_48 : f32 to vector<2x16xf32>
    %237 = arith.addf %236, %235 : vector<2x16xf32>
    %238 = arith.divf %236, %237 : vector<2x16xf32>
    %239 = vector.extract_strided_slice %232 {offsets = [0, 16], sizes = [2, 16], strides = [1, 1]} : vector<2x64xf32> to vector<2x16xf32>
    %240 = arith.negf %239 : vector<2x16xf32>
    %241 = math.exp %240 : vector<2x16xf32>
    %cst_49 = arith.constant 1.000000e+00 : f32
    %242 = vector.broadcast %cst_49 : f32 to vector<2x16xf32>
    %243 = arith.addf %242, %241 : vector<2x16xf32>
    %244 = arith.divf %242, %243 : vector<2x16xf32>
    %245 = vector.extract_strided_slice %232 {offsets = [0, 32], sizes = [2, 16], strides = [1, 1]} : vector<2x64xf32> to vector<2x16xf32>
    %246 = math.tanh %245 : vector<2x16xf32>
    %247 = vector.extract_strided_slice %232 {offsets = [0, 48], sizes = [2, 16], strides = [1, 1]} : vector<2x64xf32> to vector<2x16xf32>
    %248 = arith.negf %247 : vector<2x16xf32>
    %249 = math.exp %248 : vector<2x16xf32>
    %cst_50 = arith.constant 1.000000e+00 : f32
    %250 = vector.broadcast %cst_50 : f32 to vector<2x16xf32>
    %251 = arith.addf %250, %249 : vector<2x16xf32>
    %252 = arith.divf %250, %251 : vector<2x16xf32>
    %253 = arith.mulf %244, %220 : vector<2x16xf32>
    %254 = arith.mulf %238, %246 : vector<2x16xf32>
    %255 = arith.addf %253, %254 : vector<2x16xf32>
    %256 = math.tanh %255 : vector<2x16xf32>
    %257 = arith.mulf %252, %256 : vector<2x16xf32>
    %258 = arith.subf %257, %217 : vector<2x16xf32>
    %259 = arith.mulf %230, %258 : vector<2x16xf32>
    %260 = arith.addf %217, %259 : vector<2x16xf32>
    %261 = arith.subf %255, %220 : vector<2x16xf32>
    %262 = arith.mulf %230, %261 : vector<2x16xf32>
    %263 = arith.addf %220, %262 : vector<2x16xf32>
    %264 = vector.extract_strided_slice %260 {offsets = [0, 0], sizes = [2, 8], strides = [1, 1]} : vector<2x16xf32> to vector<2x8xf32>
    %c10_51 = arith.constant 10 : index
    %c0_52 = arith.constant 0 : index
    %265 = vector.load %arg14[%c10_51, %c0_52] : memref<16x16xf32, #tpu.memory_space<vmem>>, vector<2x8xf32>
    tpu.vector_store %arg14[%c10_51, %c0_52], %264 {strides = array<i32>} : memref<16x16xf32, #tpu.memory_space<vmem>>, vector<2x8xf32>,
    %266 = vector.extract_strided_slice %260 {offsets = [0, 8], sizes = [2, 8], strides = [1, 1]} : vector<2x16xf32> to vector<2x8xf32>
    %c4_53 = arith.constant 4 : index
    %c8_54 = arith.constant 8 : index
    %267 = vector.load %arg14[%c4_53, %c8_54] : memref<16x16xf32, #tpu.memory_space<vmem>>, vector<2x8xf32>
    tpu.vector_store %arg14[%c4_53, %c8_54], %266 {strides = array<i32>} : memref<16x16xf32, #tpu.memory_space<vmem>>, vector<2x8xf32>,
    %268 = vector.extract_strided_slice %3 {offsets = [12, 0], sizes = [2, 64], strides = [1, 1]} : vector<16x64xf32> to vector<2x64xf32>
    %269 = vector.extract_strided_slice %5 {offsets = [2, 0], sizes = [2, 64], strides = [1, 1]} : vector<16x64xf32> to vector<2x64xf32>
    %270 = arith.addf %268, %269 : vector<2x64xf32>
    %271 = vector.broadcast %6 : vector<1x64xf32> to vector<2x64xf32>
    %272 = arith.addf %270, %271 : vector<2x64xf32>
    %273 = vector.extract_strided_slice %1 {offsets = [12, 0], sizes = [2, 16], strides = [1, 1]} : vector<16x16xf32> to vector<2x16xf32>
    %cst_55 = arith.constant dense<0.000000e+00> : vector<2x64xf32>
    %274 = tpu.matmul %260, %7, %cst_55 {dimension_numbers = #tpu.dot_dimension_numbers<[1], [0], [0], [1], [0, 0, 1, 1], [], []>} : vector<2x16xf32>, vector<16x64xf32>, vector<2x64xf32> -> vector<2x64xf32>
    %275 = arith.addf %272, %274 : vector<2x64xf32>
    %276 = vector.extract_strided_slice %275 {offsets = [0, 0], sizes = [2, 16], strides = [1, 1]} : vector<2x64xf32> to vector<2x16xf32>
    %277 = arith.negf %276 : vector<2x16xf32>
    %278 = math.exp %277 : vector<2x16xf32>
    %cst_56 = arith.constant 1.000000e+00 : f32
    %279 = vector.broadcast %cst_56 : f32 to vector<2x16xf32>
    %280 = arith.addf %279, %278 : vector<2x16xf32>
    %281 = arith.divf %279, %280 : vector<2x16xf32>
    %282 = vector.extract_strided_slice %275 {offsets = [0, 16], sizes = [2, 16], strides = [1, 1]} : vector<2x64xf32> to vector<2x16xf32>
    %283 = arith.negf %282 : vector<2x16xf32>
    %284 = math.exp %283 : vector<2x16xf32>
    %cst_57 = arith.constant 1.000000e+00 : f32
    %285 = vector.broadcast %cst_57 : f32 to vector<2x16xf32>
    %286 = arith.addf %285, %284 : vector<2x16xf32>
    %287 = arith.divf %285, %286 : vector<2x16xf32>
    %288 = vector.extract_strided_slice %275 {offsets = [0, 32], sizes = [2, 16], strides = [1, 1]} : vector<2x64xf32> to vector<2x16xf32>
    %289 = math.tanh %288 : vector<2x16xf32>
    %290 = vector.extract_strided_slice %275 {offsets = [0, 48], sizes = [2, 16], strides = [1, 1]} : vector<2x64xf32> to vector<2x16xf32>
    %291 = arith.negf %290 : vector<2x16xf32>
    %292 = math.exp %291 : vector<2x16xf32>
    %cst_58 = arith.constant 1.000000e+00 : f32
    %293 = vector.broadcast %cst_58 : f32 to vector<2x16xf32>
    %294 = arith.addf %293, %292 : vector<2x16xf32>
    %295 = arith.divf %293, %294 : vector<2x16xf32>
    %296 = arith.mulf %287, %263 : vector<2x16xf32>
    %297 = arith.mulf %281, %289 : vector<2x16xf32>
    %298 = arith.addf %296, %297 : vector<2x16xf32>
    %299 = math.tanh %298 : vector<2x16xf32>
    %300 = arith.mulf %295, %299 : vector<2x16xf32>
    %301 = arith.subf %300, %260 : vector<2x16xf32>
    %302 = arith.mulf %273, %301 : vector<2x16xf32>
    %303 = arith.addf %260, %302 : vector<2x16xf32>
    %304 = arith.subf %298, %263 : vector<2x16xf32>
    %305 = arith.mulf %273, %304 : vector<2x16xf32>
    %306 = arith.addf %263, %305 : vector<2x16xf32>
    %307 = vector.extract_strided_slice %303 {offsets = [0, 0], sizes = [2, 8], strides = [1, 1]} : vector<2x16xf32> to vector<2x8xf32>
    %c12_59 = arith.constant 12 : index
    %c0_60 = arith.constant 0 : index
    %308 = vector.load %arg14[%c12_59, %c0_60] : memref<16x16xf32, #tpu.memory_space<vmem>>, vector<2x8xf32>
    tpu.vector_store %arg14[%c12_59, %c0_60], %307 {strides = array<i32>} : memref<16x16xf32, #tpu.memory_space<vmem>>, vector<2x8xf32>,
    %309 = vector.extract_strided_slice %303 {offsets = [0, 8], sizes = [2, 8], strides = [1, 1]} : vector<2x16xf32> to vector<2x8xf32>
    %c2_61 = arith.constant 2 : index
    %c8_62 = arith.constant 8 : index
    %310 = vector.load %arg14[%c2_61, %c8_62] : memref<16x16xf32, #tpu.memory_space<vmem>>, vector<2x8xf32>
    tpu.vector_store %arg14[%c2_61, %c8_62], %309 {strides = array<i32>} : memref<16x16xf32, #tpu.memory_space<vmem>>, vector<2x8xf32>,
    %311 = vector.extract_strided_slice %3 {offsets = [14, 0], sizes = [2, 64], strides = [1, 1]} : vector<16x64xf32> to vector<2x64xf32>
    %312 = vector.extract_strided_slice %5 {offsets = [0, 0], sizes = [2, 64], strides = [1, 1]} : vector<16x64xf32> to vector<2x64xf32>
    %313 = arith.addf %311, %312 : vector<2x64xf32>
    %314 = vector.broadcast %6 : vector<1x64xf32> to vector<2x64xf32>
    %315 = arith.addf %313, %314 : vector<2x64xf32>
    %316 = vector.extract_strided_slice %1 {offsets = [14, 0], sizes = [2, 16], strides = [1, 1]} : vector<16x16xf32> to vector<2x16xf32>
    %cst_63 = arith.constant dense<0.000000e+00> : vector<2x64xf32>
    %317 = tpu.matmul %303, %7, %cst_63 {dimension_numbers = #tpu.dot_dimension_numbers<[1], [0], [0], [1], [0, 0, 1, 1], [], []>} : vector<2x16xf32>, vector<16x64xf32>, vector<2x64xf32> -> vector<2x64xf32>
    %318 = arith.addf %315, %317 : vector<2x64xf32>
    %319 = vector.extract_strided_slice %318 {offsets = [0, 0], sizes = [2, 16], strides = [1, 1]} : vector<2x64xf32> to vector<2x16xf32>
    %320 = arith.negf %319 : vector<2x16xf32>
    %321 = math.exp %320 : vector<2x16xf32>
    %cst_64 = arith.constant 1.000000e+00 : f32
    %322 = vector.broadcast %cst_64 : f32 to vector<2x16xf32>
    %323 = arith.addf %322, %321 : vector<2x16xf32>
    %324 = arith.divf %322, %323 : vector<2x16xf32>
    %325 = vector.extract_strided_slice %318 {offsets = [0, 16], sizes = [2, 16], strides = [1, 1]} : vector<2x64xf32> to vector<2x16xf32>
    %326 = arith.negf %325 : vector<2x16xf32>
    %327 = math.exp %326 : vector<2x16xf32>
    %cst_65 = arith.constant 1.000000e+00 : f32
    %328 = vector.broadcast %cst_65 : f32 to vector<2x16xf32>
    %329 = arith.addf %328, %327 : vector<2x16xf32>
    %330 = arith.divf %328, %329 : vector<2x16xf32>
    %331 = vector.extract_strided_slice %318 {offsets = [0, 32], sizes = [2, 16], strides = [1, 1]} : vector<2x64xf32> to vector<2x16xf32>
    %332 = math.tanh %331 : vector<2x16xf32>
    %333 = vector.extract_strided_slice %318 {offsets = [0, 48], sizes = [2, 16], strides = [1, 1]} : vector<2x64xf32> to vector<2x16xf32>
    %334 = arith.negf %333 : vector<2x16xf32>
    %335 = math.exp %334 : vector<2x16xf32>
    %cst_66 = arith.constant 1.000000e+00 : f32
    %336 = vector.broadcast %cst_66 : f32 to vector<2x16xf32>
    %337 = arith.addf %336, %335 : vector<2x16xf32>
    %338 = arith.divf %336, %337 : vector<2x16xf32>
    %339 = arith.mulf %330, %306 : vector<2x16xf32>
    %340 = arith.mulf %324, %332 : vector<2x16xf32>
    %341 = arith.addf %339, %340 : vector<2x16xf32>
    %342 = math.tanh %341 : vector<2x16xf32>
    %343 = arith.mulf %338, %342 : vector<2x16xf32>
    %344 = arith.subf %343, %303 : vector<2x16xf32>
    %345 = arith.mulf %316, %344 : vector<2x16xf32>
    %346 = arith.addf %303, %345 : vector<2x16xf32>
    %347 = arith.subf %341, %306 : vector<2x16xf32>
    %348 = arith.mulf %316, %347 : vector<2x16xf32>
    %349 = arith.addf %306, %348 : vector<2x16xf32>
    %350 = vector.extract_strided_slice %346 {offsets = [0, 0], sizes = [2, 8], strides = [1, 1]} : vector<2x16xf32> to vector<2x8xf32>
    %c14_67 = arith.constant 14 : index
    %c0_68 = arith.constant 0 : index
    %351 = vector.load %arg14[%c14_67, %c0_68] : memref<16x16xf32, #tpu.memory_space<vmem>>, vector<2x8xf32>
    tpu.vector_store %arg14[%c14_67, %c0_68], %350 {strides = array<i32>} : memref<16x16xf32, #tpu.memory_space<vmem>>, vector<2x8xf32>,
    %352 = vector.extract_strided_slice %346 {offsets = [0, 8], sizes = [2, 8], strides = [1, 1]} : vector<2x16xf32> to vector<2x8xf32>
    %c0_69 = arith.constant 0 : index
    %c8_70 = arith.constant 8 : index
    %353 = vector.load %arg14[%c0_69, %c8_70] : memref<16x16xf32, #tpu.memory_space<vmem>>, vector<2x8xf32>
    tpu.vector_store %arg14[%c0_69, %c8_70], %352 {strides = array<i32>} : memref<16x16xf32, #tpu.memory_space<vmem>>, vector<2x8xf32>,
    %c0_71 = arith.constant 0 : index
    %c0_72 = arith.constant 0 : index
    %354 = vector.load %arg14[%c0_71, %c0_72] : memref<16x16xf32, #tpu.memory_space<vmem>>, vector<16x16xf32>
    %c0_73 = arith.constant 0 : index
    %c0_74 = arith.constant 0 : index
    %355 = vector.load %arg6[%c0_73, %c0_74] : memref<16x64xf32, #tpu.memory_space<vmem>>, vector<16x64xf32>
    %cst_75 = arith.constant dense<0.000000e+00> : vector<16x64xf32>
    %356 = tpu.matmul %354, %355, %cst_75 {dimension_numbers = #tpu.dot_dimension_numbers<[1], [0], [0], [1], [0, 0, 1, 1], [], []>} : vector<16x16xf32>, vector<16x64xf32>, vector<16x64xf32> -> vector<16x64xf32>
    %c0_76 = arith.constant 0 : index
    %c0_77 = arith.constant 0 : index
    %357 = vector.load %arg7[%c0_76, %c0_77] : memref<16x64xf32, #tpu.memory_space<vmem>>, vector<16x64xf32>
    %cst_78 = arith.constant dense<0.000000e+00> : vector<16x64xf32>
    %358 = tpu.matmul %354, %357, %cst_78 {dimension_numbers = #tpu.dot_dimension_numbers<[1], [0], [0], [1], [0, 0, 1, 1], [], []>} : vector<16x16xf32>, vector<16x64xf32>, vector<16x64xf32> -> vector<16x64xf32>
    %c0_79 = arith.constant 0 : index
    %c0_80 = arith.constant 0 : index
    %359 = vector.load %arg9[%c0_79, %c0_80] : memref<1x64xf32, #tpu.memory_space<vmem>>, vector<1x64xf32>
    %c0_81 = arith.constant 0 : index
    %c0_82 = arith.constant 0 : index
    %360 = vector.load %arg8[%c0_81, %c0_82] : memref<16x64xf32, #tpu.memory_space<vmem>>, vector<16x64xf32>
    %cst_83 = arith.constant 0.000000e+00 : f32
    %361 = vector.broadcast %cst_83 : f32 to vector<2x16xf32>
    %cst_84 = arith.constant 0.000000e+00 : f32
    %362 = vector.broadcast %cst_84 : f32 to vector<2x16xf32>
    %363 = vector.extract_strided_slice %356 {offsets = [0, 0], sizes = [2, 64], strides = [1, 1]} : vector<16x64xf32> to vector<2x64xf32>
    %364 = vector.extract_strided_slice %358 {offsets = [14, 0], sizes = [2, 64], strides = [1, 1]} : vector<16x64xf32> to vector<2x64xf32>
    %365 = arith.addf %363, %364 : vector<2x64xf32>
    %366 = vector.broadcast %359 : vector<1x64xf32> to vector<2x64xf32>
    %367 = arith.addf %365, %366 : vector<2x64xf32>
    %368 = vector.extract_strided_slice %1 {offsets = [0, 0], sizes = [2, 16], strides = [1, 1]} : vector<16x16xf32> to vector<2x16xf32>
    %cst_85 = arith.constant dense<0.000000e+00> : vector<2x64xf32>
    %369 = tpu.matmul %361, %360, %cst_85 {dimension_numbers = #tpu.dot_dimension_numbers<[1], [0], [0], [1], [0, 0, 1, 1], [], []>} : vector<2x16xf32>, vector<16x64xf32>, vector<2x64xf32> -> vector<2x64xf32>
    %370 = arith.addf %367, %369 : vector<2x64xf32>
    %371 = vector.extract_strided_slice %370 {offsets = [0, 0], sizes = [2, 16], strides = [1, 1]} : vector<2x64xf32> to vector<2x16xf32>
    %372 = arith.negf %371 : vector<2x16xf32>
    %373 = math.exp %372 : vector<2x16xf32>
    %cst_86 = arith.constant 1.000000e+00 : f32
    %374 = vector.broadcast %cst_86 : f32 to vector<2x16xf32>
    %375 = arith.addf %374, %373 : vector<2x16xf32>
    %376 = arith.divf %374, %375 : vector<2x16xf32>
    %377 = vector.extract_strided_slice %370 {offsets = [0, 16], sizes = [2, 16], strides = [1, 1]} : vector<2x64xf32> to vector<2x16xf32>
    %378 = arith.negf %377 : vector<2x16xf32>
    %379 = math.exp %378 : vector<2x16xf32>
    %cst_87 = arith.constant 1.000000e+00 : f32
    %380 = vector.broadcast %cst_87 : f32 to vector<2x16xf32>
    %381 = arith.addf %380, %379 : vector<2x16xf32>
    %382 = arith.divf %380, %381 : vector<2x16xf32>
    %383 = vector.extract_strided_slice %370 {offsets = [0, 32], sizes = [2, 16], strides = [1, 1]} : vector<2x64xf32> to vector<2x16xf32>
    %384 = math.tanh %383 : vector<2x16xf32>
    %385 = vector.extract_strided_slice %370 {offsets = [0, 48], sizes = [2, 16], strides = [1, 1]} : vector<2x64xf32> to vector<2x16xf32>
    %386 = arith.negf %385 : vector<2x16xf32>
    %387 = math.exp %386 : vector<2x16xf32>
    %cst_88 = arith.constant 1.000000e+00 : f32
    %388 = vector.broadcast %cst_88 : f32 to vector<2x16xf32>
    %389 = arith.addf %388, %387 : vector<2x16xf32>
    %390 = arith.divf %388, %389 : vector<2x16xf32>
    %391 = arith.mulf %382, %362 : vector<2x16xf32>
    %392 = arith.mulf %376, %384 : vector<2x16xf32>
    %393 = arith.addf %391, %392 : vector<2x16xf32>
    %394 = math.tanh %393 : vector<2x16xf32>
    %395 = arith.mulf %390, %394 : vector<2x16xf32>
    %396 = arith.subf %395, %361 : vector<2x16xf32>
    %397 = arith.mulf %368, %396 : vector<2x16xf32>
    %398 = arith.addf %361, %397 : vector<2x16xf32>
    %399 = arith.subf %393, %362 : vector<2x16xf32>
    %400 = arith.mulf %368, %399 : vector<2x16xf32>
    %401 = arith.addf %362, %400 : vector<2x16xf32>
    %402 = vector.extract_strided_slice %356 {offsets = [2, 0], sizes = [2, 64], strides = [1, 1]} : vector<16x64xf32> to vector<2x64xf32>
    %403 = vector.extract_strided_slice %358 {offsets = [12, 0], sizes = [2, 64], strides = [1, 1]} : vector<16x64xf32> to vector<2x64xf32>
    %404 = arith.addf %402, %403 : vector<2x64xf32>
    %405 = vector.broadcast %359 : vector<1x64xf32> to vector<2x64xf32>
    %406 = arith.addf %404, %405 : vector<2x64xf32>
    %407 = vector.extract_strided_slice %1 {offsets = [2, 0], sizes = [2, 16], strides = [1, 1]} : vector<16x16xf32> to vector<2x16xf32>
    %cst_89 = arith.constant dense<0.000000e+00> : vector<2x64xf32>
    %408 = tpu.matmul %398, %360, %cst_89 {dimension_numbers = #tpu.dot_dimension_numbers<[1], [0], [0], [1], [0, 0, 1, 1], [], []>} : vector<2x16xf32>, vector<16x64xf32>, vector<2x64xf32> -> vector<2x64xf32>
    %409 = arith.addf %406, %408 : vector<2x64xf32>
    %410 = vector.extract_strided_slice %409 {offsets = [0, 0], sizes = [2, 16], strides = [1, 1]} : vector<2x64xf32> to vector<2x16xf32>
    %411 = arith.negf %410 : vector<2x16xf32>
    %412 = math.exp %411 : vector<2x16xf32>
    %cst_90 = arith.constant 1.000000e+00 : f32
    %413 = vector.broadcast %cst_90 : f32 to vector<2x16xf32>
    %414 = arith.addf %413, %412 : vector<2x16xf32>
    %415 = arith.divf %413, %414 : vector<2x16xf32>
    %416 = vector.extract_strided_slice %409 {offsets = [0, 16], sizes = [2, 16], strides = [1, 1]} : vector<2x64xf32> to vector<2x16xf32>
    %417 = arith.negf %416 : vector<2x16xf32>
    %418 = math.exp %417 : vector<2x16xf32>
    %cst_91 = arith.constant 1.000000e+00 : f32
    %419 = vector.broadcast %cst_91 : f32 to vector<2x16xf32>
    %420 = arith.addf %419, %418 : vector<2x16xf32>
    %421 = arith.divf %419, %420 : vector<2x16xf32>
    %422 = vector.extract_strided_slice %409 {offsets = [0, 32], sizes = [2, 16], strides = [1, 1]} : vector<2x64xf32> to vector<2x16xf32>
    %423 = math.tanh %422 : vector<2x16xf32>
    %424 = vector.extract_strided_slice %409 {offsets = [0, 48], sizes = [2, 16], strides = [1, 1]} : vector<2x64xf32> to vector<2x16xf32>
    %425 = arith.negf %424 : vector<2x16xf32>
    %426 = math.exp %425 : vector<2x16xf32>
    %cst_92 = arith.constant 1.000000e+00 : f32
    %427 = vector.broadcast %cst_92 : f32 to vector<2x16xf32>
    %428 = arith.addf %427, %426 : vector<2x16xf32>
    %429 = arith.divf %427, %428 : vector<2x16xf32>
    %430 = arith.mulf %421, %401 : vector<2x16xf32>
    %431 = arith.mulf %415, %423 : vector<2x16xf32>
    %432 = arith.addf %430, %431 : vector<2x16xf32>
    %433 = math.tanh %432 : vector<2x16xf32>
    %434 = arith.mulf %429, %433 : vector<2x16xf32>
    %435 = arith.subf %434, %398 : vector<2x16xf32>
    %436 = arith.mulf %407, %435 : vector<2x16xf32>
    %437 = arith.addf %398, %436 : vector<2x16xf32>
    %438 = arith.subf %432, %401 : vector<2x16xf32>
    %439 = arith.mulf %407, %438 : vector<2x16xf32>
    %440 = arith.addf %401, %439 : vector<2x16xf32>
    %441 = vector.extract_strided_slice %356 {offsets = [4, 0], sizes = [2, 64], strides = [1, 1]} : vector<16x64xf32> to vector<2x64xf32>
    %442 = vector.extract_strided_slice %358 {offsets = [10, 0], sizes = [2, 64], strides = [1, 1]} : vector<16x64xf32> to vector<2x64xf32>
    %443 = arith.addf %441, %442 : vector<2x64xf32>
    %444 = vector.broadcast %359 : vector<1x64xf32> to vector<2x64xf32>
    %445 = arith.addf %443, %444 : vector<2x64xf32>
    %446 = vector.extract_strided_slice %1 {offsets = [4, 0], sizes = [2, 16], strides = [1, 1]} : vector<16x16xf32> to vector<2x16xf32>
    %cst_93 = arith.constant dense<0.000000e+00> : vector<2x64xf32>
    %447 = tpu.matmul %437, %360, %cst_93 {dimension_numbers = #tpu.dot_dimension_numbers<[1], [0], [0], [1], [0, 0, 1, 1], [], []>} : vector<2x16xf32>, vector<16x64xf32>, vector<2x64xf32> -> vector<2x64xf32>
    %448 = arith.addf %445, %447 : vector<2x64xf32>
    %449 = vector.extract_strided_slice %448 {offsets = [0, 0], sizes = [2, 16], strides = [1, 1]} : vector<2x64xf32> to vector<2x16xf32>
    %450 = arith.negf %449 : vector<2x16xf32>
    %451 = math.exp %450 : vector<2x16xf32>
    %cst_94 = arith.constant 1.000000e+00 : f32
    %452 = vector.broadcast %cst_94 : f32 to vector<2x16xf32>
    %453 = arith.addf %452, %451 : vector<2x16xf32>
    %454 = arith.divf %452, %453 : vector<2x16xf32>
    %455 = vector.extract_strided_slice %448 {offsets = [0, 16], sizes = [2, 16], strides = [1, 1]} : vector<2x64xf32> to vector<2x16xf32>
    %456 = arith.negf %455 : vector<2x16xf32>
    %457 = math.exp %456 : vector<2x16xf32>
    %cst_95 = arith.constant 1.000000e+00 : f32
    %458 = vector.broadcast %cst_95 : f32 to vector<2x16xf32>
    %459 = arith.addf %458, %457 : vector<2x16xf32>
    %460 = arith.divf %458, %459 : vector<2x16xf32>
    %461 = vector.extract_strided_slice %448 {offsets = [0, 32], sizes = [2, 16], strides = [1, 1]} : vector<2x64xf32> to vector<2x16xf32>
    %462 = math.tanh %461 : vector<2x16xf32>
    %463 = vector.extract_strided_slice %448 {offsets = [0, 48], sizes = [2, 16], strides = [1, 1]} : vector<2x64xf32> to vector<2x16xf32>
    %464 = arith.negf %463 : vector<2x16xf32>
    %465 = math.exp %464 : vector<2x16xf32>
    %cst_96 = arith.constant 1.000000e+00 : f32
    %466 = vector.broadcast %cst_96 : f32 to vector<2x16xf32>
    %467 = arith.addf %466, %465 : vector<2x16xf32>
    %468 = arith.divf %466, %467 : vector<2x16xf32>
    %469 = arith.mulf %460, %440 : vector<2x16xf32>
    %470 = arith.mulf %454, %462 : vector<2x16xf32>
    %471 = arith.addf %469, %470 : vector<2x16xf32>
    %472 = math.tanh %471 : vector<2x16xf32>
    %473 = arith.mulf %468, %472 : vector<2x16xf32>
    %474 = arith.subf %473, %437 : vector<2x16xf32>
    %475 = arith.mulf %446, %474 : vector<2x16xf32>
    %476 = arith.addf %437, %475 : vector<2x16xf32>
    %477 = arith.subf %471, %440 : vector<2x16xf32>
    %478 = arith.mulf %446, %477 : vector<2x16xf32>
    %479 = arith.addf %440, %478 : vector<2x16xf32>
    %480 = vector.extract_strided_slice %356 {offsets = [6, 0], sizes = [2, 64], strides = [1, 1]} : vector<16x64xf32> to vector<2x64xf32>
    %481 = vector.extract_strided_slice %358 {offsets = [8, 0], sizes = [2, 64], strides = [1, 1]} : vector<16x64xf32> to vector<2x64xf32>
    %482 = arith.addf %480, %481 : vector<2x64xf32>
    %483 = vector.broadcast %359 : vector<1x64xf32> to vector<2x64xf32>
    %484 = arith.addf %482, %483 : vector<2x64xf32>
    %485 = vector.extract_strided_slice %1 {offsets = [6, 0], sizes = [2, 16], strides = [1, 1]} : vector<16x16xf32> to vector<2x16xf32>
    %cst_97 = arith.constant dense<0.000000e+00> : vector<2x64xf32>
    %486 = tpu.matmul %476, %360, %cst_97 {dimension_numbers = #tpu.dot_dimension_numbers<[1], [0], [0], [1], [0, 0, 1, 1], [], []>} : vector<2x16xf32>, vector<16x64xf32>, vector<2x64xf32> -> vector<2x64xf32>
    %487 = arith.addf %484, %486 : vector<2x64xf32>
    %488 = vector.extract_strided_slice %487 {offsets = [0, 0], sizes = [2, 16], strides = [1, 1]} : vector<2x64xf32> to vector<2x16xf32>
    %489 = arith.negf %488 : vector<2x16xf32>
    %490 = math.exp %489 : vector<2x16xf32>
    %cst_98 = arith.constant 1.000000e+00 : f32
    %491 = vector.broadcast %cst_98 : f32 to vector<2x16xf32>
    %492 = arith.addf %491, %490 : vector<2x16xf32>
    %493 = arith.divf %491, %492 : vector<2x16xf32>
    %494 = vector.extract_strided_slice %487 {offsets = [0, 16], sizes = [2, 16], strides = [1, 1]} : vector<2x64xf32> to vector<2x16xf32>
    %495 = arith.negf %494 : vector<2x16xf32>
    %496 = math.exp %495 : vector<2x16xf32>
    %cst_99 = arith.constant 1.000000e+00 : f32
    %497 = vector.broadcast %cst_99 : f32 to vector<2x16xf32>
    %498 = arith.addf %497, %496 : vector<2x16xf32>
    %499 = arith.divf %497, %498 : vector<2x16xf32>
    %500 = vector.extract_strided_slice %487 {offsets = [0, 32], sizes = [2, 16], strides = [1, 1]} : vector<2x64xf32> to vector<2x16xf32>
    %501 = math.tanh %500 : vector<2x16xf32>
    %502 = vector.extract_strided_slice %487 {offsets = [0, 48], sizes = [2, 16], strides = [1, 1]} : vector<2x64xf32> to vector<2x16xf32>
    %503 = arith.negf %502 : vector<2x16xf32>
    %504 = math.exp %503 : vector<2x16xf32>
    %cst_100 = arith.constant 1.000000e+00 : f32
    %505 = vector.broadcast %cst_100 : f32 to vector<2x16xf32>
    %506 = arith.addf %505, %504 : vector<2x16xf32>
    %507 = arith.divf %505, %506 : vector<2x16xf32>
    %508 = arith.mulf %499, %479 : vector<2x16xf32>
    %509 = arith.mulf %493, %501 : vector<2x16xf32>
    %510 = arith.addf %508, %509 : vector<2x16xf32>
    %511 = math.tanh %510 : vector<2x16xf32>
    %512 = arith.mulf %507, %511 : vector<2x16xf32>
    %513 = arith.subf %512, %476 : vector<2x16xf32>
    %514 = arith.mulf %485, %513 : vector<2x16xf32>
    %515 = arith.addf %476, %514 : vector<2x16xf32>
    %516 = arith.subf %510, %479 : vector<2x16xf32>
    %517 = arith.mulf %485, %516 : vector<2x16xf32>
    %518 = arith.addf %479, %517 : vector<2x16xf32>
    %519 = vector.extract_strided_slice %356 {offsets = [8, 0], sizes = [2, 64], strides = [1, 1]} : vector<16x64xf32> to vector<2x64xf32>
    %520 = vector.extract_strided_slice %358 {offsets = [6, 0], sizes = [2, 64], strides = [1, 1]} : vector<16x64xf32> to vector<2x64xf32>
    %521 = arith.addf %519, %520 : vector<2x64xf32>
    %522 = vector.broadcast %359 : vector<1x64xf32> to vector<2x64xf32>
    %523 = arith.addf %521, %522 : vector<2x64xf32>
    %524 = vector.extract_strided_slice %1 {offsets = [8, 0], sizes = [2, 16], strides = [1, 1]} : vector<16x16xf32> to vector<2x16xf32>
    %cst_101 = arith.constant dense<0.000000e+00> : vector<2x64xf32>
    %525 = tpu.matmul %515, %360, %cst_101 {dimension_numbers = #tpu.dot_dimension_numbers<[1], [0], [0], [1], [0, 0, 1, 1], [], []>} : vector<2x16xf32>, vector<16x64xf32>, vector<2x64xf32> -> vector<2x64xf32>
    %526 = arith.addf %523, %525 : vector<2x64xf32>
    %527 = vector.extract_strided_slice %526 {offsets = [0, 0], sizes = [2, 16], strides = [1, 1]} : vector<2x64xf32> to vector<2x16xf32>
    %528 = arith.negf %527 : vector<2x16xf32>
    %529 = math.exp %528 : vector<2x16xf32>
    %cst_102 = arith.constant 1.000000e+00 : f32
    %530 = vector.broadcast %cst_102 : f32 to vector<2x16xf32>
    %531 = arith.addf %530, %529 : vector<2x16xf32>
    %532 = arith.divf %530, %531 : vector<2x16xf32>
    %533 = vector.extract_strided_slice %526 {offsets = [0, 16], sizes = [2, 16], strides = [1, 1]} : vector<2x64xf32> to vector<2x16xf32>
    %534 = arith.negf %533 : vector<2x16xf32>
    %535 = math.exp %534 : vector<2x16xf32>
    %cst_103 = arith.constant 1.000000e+00 : f32
    %536 = vector.broadcast %cst_103 : f32 to vector<2x16xf32>
    %537 = arith.addf %536, %535 : vector<2x16xf32>
    %538 = arith.divf %536, %537 : vector<2x16xf32>
    %539 = vector.extract_strided_slice %526 {offsets = [0, 32], sizes = [2, 16], strides = [1, 1]} : vector<2x64xf32> to vector<2x16xf32>
    %540 = math.tanh %539 : vector<2x16xf32>
    %541 = vector.extract_strided_slice %526 {offsets = [0, 48], sizes = [2, 16], strides = [1, 1]} : vector<2x64xf32> to vector<2x16xf32>
    %542 = arith.negf %541 : vector<2x16xf32>
    %543 = math.exp %542 : vector<2x16xf32>
    %cst_104 = arith.constant 1.000000e+00 : f32
    %544 = vector.broadcast %cst_104 : f32 to vector<2x16xf32>
    %545 = arith.addf %544, %543 : vector<2x16xf32>
    %546 = arith.divf %544, %545 : vector<2x16xf32>
    %547 = arith.mulf %538, %518 : vector<2x16xf32>
    %548 = arith.mulf %532, %540 : vector<2x16xf32>
    %549 = arith.addf %547, %548 : vector<2x16xf32>
    %550 = math.tanh %549 : vector<2x16xf32>
    %551 = arith.mulf %546, %550 : vector<2x16xf32>
    %552 = arith.subf %551, %515 : vector<2x16xf32>
    %553 = arith.mulf %524, %552 : vector<2x16xf32>
    %554 = arith.addf %515, %553 : vector<2x16xf32>
    %555 = arith.subf %549, %518 : vector<2x16xf32>
    %556 = arith.mulf %524, %555 : vector<2x16xf32>
    %557 = arith.addf %518, %556 : vector<2x16xf32>
    %558 = vector.extract_strided_slice %356 {offsets = [10, 0], sizes = [2, 64], strides = [1, 1]} : vector<16x64xf32> to vector<2x64xf32>
    %559 = vector.extract_strided_slice %358 {offsets = [4, 0], sizes = [2, 64], strides = [1, 1]} : vector<16x64xf32> to vector<2x64xf32>
    %560 = arith.addf %558, %559 : vector<2x64xf32>
    %561 = vector.broadcast %359 : vector<1x64xf32> to vector<2x64xf32>
    %562 = arith.addf %560, %561 : vector<2x64xf32>
    %563 = vector.extract_strided_slice %1 {offsets = [10, 0], sizes = [2, 16], strides = [1, 1]} : vector<16x16xf32> to vector<2x16xf32>
    %cst_105 = arith.constant dense<0.000000e+00> : vector<2x64xf32>
    %564 = tpu.matmul %554, %360, %cst_105 {dimension_numbers = #tpu.dot_dimension_numbers<[1], [0], [0], [1], [0, 0, 1, 1], [], []>} : vector<2x16xf32>, vector<16x64xf32>, vector<2x64xf32> -> vector<2x64xf32>
    %565 = arith.addf %562, %564 : vector<2x64xf32>
    %566 = vector.extract_strided_slice %565 {offsets = [0, 0], sizes = [2, 16], strides = [1, 1]} : vector<2x64xf32> to vector<2x16xf32>
    %567 = arith.negf %566 : vector<2x16xf32>
    %568 = math.exp %567 : vector<2x16xf32>
    %cst_106 = arith.constant 1.000000e+00 : f32
    %569 = vector.broadcast %cst_106 : f32 to vector<2x16xf32>
    %570 = arith.addf %569, %568 : vector<2x16xf32>
    %571 = arith.divf %569, %570 : vector<2x16xf32>
    %572 = vector.extract_strided_slice %565 {offsets = [0, 16], sizes = [2, 16], strides = [1, 1]} : vector<2x64xf32> to vector<2x16xf32>
    %573 = arith.negf %572 : vector<2x16xf32>
    %574 = math.exp %573 : vector<2x16xf32>
    %cst_107 = arith.constant 1.000000e+00 : f32
    %575 = vector.broadcast %cst_107 : f32 to vector<2x16xf32>
    %576 = arith.addf %575, %574 : vector<2x16xf32>
    %577 = arith.divf %575, %576 : vector<2x16xf32>
    %578 = vector.extract_strided_slice %565 {offsets = [0, 32], sizes = [2, 16], strides = [1, 1]} : vector<2x64xf32> to vector<2x16xf32>
    %579 = math.tanh %578 : vector<2x16xf32>
    %580 = vector.extract_strided_slice %565 {offsets = [0, 48], sizes = [2, 16], strides = [1, 1]} : vector<2x64xf32> to vector<2x16xf32>
    %581 = arith.negf %580 : vector<2x16xf32>
    %582 = math.exp %581 : vector<2x16xf32>
    %cst_108 = arith.constant 1.000000e+00 : f32
    %583 = vector.broadcast %cst_108 : f32 to vector<2x16xf32>
    %584 = arith.addf %583, %582 : vector<2x16xf32>
    %585 = arith.divf %583, %584 : vector<2x16xf32>
    %586 = arith.mulf %577, %557 : vector<2x16xf32>
    %587 = arith.mulf %571, %579 : vector<2x16xf32>
    %588 = arith.addf %586, %587 : vector<2x16xf32>
    %589 = math.tanh %588 : vector<2x16xf32>
    %590 = arith.mulf %585, %589 : vector<2x16xf32>
    %591 = arith.subf %590, %554 : vector<2x16xf32>
    %592 = arith.mulf %563, %591 : vector<2x16xf32>
    %593 = arith.addf %554, %592 : vector<2x16xf32>
    %594 = arith.subf %588, %557 : vector<2x16xf32>
    %595 = arith.mulf %563, %594 : vector<2x16xf32>
    %596 = arith.addf %557, %595 : vector<2x16xf32>
    %597 = vector.extract_strided_slice %356 {offsets = [12, 0], sizes = [2, 64], strides = [1, 1]} : vector<16x64xf32> to vector<2x64xf32>
    %598 = vector.extract_strided_slice %358 {offsets = [2, 0], sizes = [2, 64], strides = [1, 1]} : vector<16x64xf32> to vector<2x64xf32>
    %599 = arith.addf %597, %598 : vector<2x64xf32>
    %600 = vector.broadcast %359 : vector<1x64xf32> to vector<2x64xf32>
    %601 = arith.addf %599, %600 : vector<2x64xf32>
    %602 = vector.extract_strided_slice %1 {offsets = [12, 0], sizes = [2, 16], strides = [1, 1]} : vector<16x16xf32> to vector<2x16xf32>
    %cst_109 = arith.constant dense<0.000000e+00> : vector<2x64xf32>
    %603 = tpu.matmul %593, %360, %cst_109 {dimension_numbers = #tpu.dot_dimension_numbers<[1], [0], [0], [1], [0, 0, 1, 1], [], []>} : vector<2x16xf32>, vector<16x64xf32>, vector<2x64xf32> -> vector<2x64xf32>
    %604 = arith.addf %601, %603 : vector<2x64xf32>
    %605 = vector.extract_strided_slice %604 {offsets = [0, 0], sizes = [2, 16], strides = [1, 1]} : vector<2x64xf32> to vector<2x16xf32>
    %606 = arith.negf %605 : vector<2x16xf32>
    %607 = math.exp %606 : vector<2x16xf32>
    %cst_110 = arith.constant 1.000000e+00 : f32
    %608 = vector.broadcast %cst_110 : f32 to vector<2x16xf32>
    %609 = arith.addf %608, %607 : vector<2x16xf32>
    %610 = arith.divf %608, %609 : vector<2x16xf32>
    %611 = vector.extract_strided_slice %604 {offsets = [0, 16], sizes = [2, 16], strides = [1, 1]} : vector<2x64xf32> to vector<2x16xf32>
    %612 = arith.negf %611 : vector<2x16xf32>
    %613 = math.exp %612 : vector<2x16xf32>
    %cst_111 = arith.constant 1.000000e+00 : f32
    %614 = vector.broadcast %cst_111 : f32 to vector<2x16xf32>
    %615 = arith.addf %614, %613 : vector<2x16xf32>
    %616 = arith.divf %614, %615 : vector<2x16xf32>
    %617 = vector.extract_strided_slice %604 {offsets = [0, 32], sizes = [2, 16], strides = [1, 1]} : vector<2x64xf32> to vector<2x16xf32>
    %618 = math.tanh %617 : vector<2x16xf32>
    %619 = vector.extract_strided_slice %604 {offsets = [0, 48], sizes = [2, 16], strides = [1, 1]} : vector<2x64xf32> to vector<2x16xf32>
    %620 = arith.negf %619 : vector<2x16xf32>
    %621 = math.exp %620 : vector<2x16xf32>
    %cst_112 = arith.constant 1.000000e+00 : f32
    %622 = vector.broadcast %cst_112 : f32 to vector<2x16xf32>
    %623 = arith.addf %622, %621 : vector<2x16xf32>
    %624 = arith.divf %622, %623 : vector<2x16xf32>
    %625 = arith.mulf %616, %596 : vector<2x16xf32>
    %626 = arith.mulf %610, %618 : vector<2x16xf32>
    %627 = arith.addf %625, %626 : vector<2x16xf32>
    %628 = math.tanh %627 : vector<2x16xf32>
    %629 = arith.mulf %624, %628 : vector<2x16xf32>
    %630 = arith.subf %629, %593 : vector<2x16xf32>
    %631 = arith.mulf %602, %630 : vector<2x16xf32>
    %632 = arith.addf %593, %631 : vector<2x16xf32>
    %633 = arith.subf %627, %596 : vector<2x16xf32>
    %634 = arith.mulf %602, %633 : vector<2x16xf32>
    %635 = arith.addf %596, %634 : vector<2x16xf32>
    %636 = vector.extract_strided_slice %356 {offsets = [14, 0], sizes = [2, 64], strides = [1, 1]} : vector<16x64xf32> to vector<2x64xf32>
    %637 = vector.extract_strided_slice %358 {offsets = [0, 0], sizes = [2, 64], strides = [1, 1]} : vector<16x64xf32> to vector<2x64xf32>
    %638 = arith.addf %636, %637 : vector<2x64xf32>
    %639 = vector.broadcast %359 : vector<1x64xf32> to vector<2x64xf32>
    %640 = arith.addf %638, %639 : vector<2x64xf32>
    %641 = vector.extract_strided_slice %1 {offsets = [14, 0], sizes = [2, 16], strides = [1, 1]} : vector<16x16xf32> to vector<2x16xf32>
    %cst_113 = arith.constant dense<0.000000e+00> : vector<2x64xf32>
    %642 = tpu.matmul %632, %360, %cst_113 {dimension_numbers = #tpu.dot_dimension_numbers<[1], [0], [0], [1], [0, 0, 1, 1], [], []>} : vector<2x16xf32>, vector<16x64xf32>, vector<2x64xf32> -> vector<2x64xf32>
    %643 = arith.addf %640, %642 : vector<2x64xf32>
    %644 = vector.extract_strided_slice %643 {offsets = [0, 0], sizes = [2, 16], strides = [1, 1]} : vector<2x64xf32> to vector<2x16xf32>
    %645 = arith.negf %644 : vector<2x16xf32>
    %646 = math.exp %645 : vector<2x16xf32>
    %cst_114 = arith.constant 1.000000e+00 : f32
    %647 = vector.broadcast %cst_114 : f32 to vector<2x16xf32>
    %648 = arith.addf %647, %646 : vector<2x16xf32>
    %649 = arith.divf %647, %648 : vector<2x16xf32>
    %650 = vector.extract_strided_slice %643 {offsets = [0, 16], sizes = [2, 16], strides = [1, 1]} : vector<2x64xf32> to vector<2x16xf32>
    %651 = arith.negf %650 : vector<2x16xf32>
    %652 = math.exp %651 : vector<2x16xf32>
    %cst_115 = arith.constant 1.000000e+00 : f32
    %653 = vector.broadcast %cst_115 : f32 to vector<2x16xf32>
    %654 = arith.addf %653, %652 : vector<2x16xf32>
    %655 = arith.divf %653, %654 : vector<2x16xf32>
    %656 = vector.extract_strided_slice %643 {offsets = [0, 32], sizes = [2, 16], strides = [1, 1]} : vector<2x64xf32> to vector<2x16xf32>
    %657 = math.tanh %656 : vector<2x16xf32>
    %658 = vector.extract_strided_slice %643 {offsets = [0, 48], sizes = [2, 16], strides = [1, 1]} : vector<2x64xf32> to vector<2x16xf32>
    %659 = arith.negf %658 : vector<2x16xf32>
    %660 = math.exp %659 : vector<2x16xf32>
    %cst_116 = arith.constant 1.000000e+00 : f32
    %661 = vector.broadcast %cst_116 : f32 to vector<2x16xf32>
    %662 = arith.addf %661, %660 : vector<2x16xf32>
    %663 = arith.divf %661, %662 : vector<2x16xf32>
    %664 = arith.mulf %655, %635 : vector<2x16xf32>
    %665 = arith.mulf %649, %657 : vector<2x16xf32>
    %666 = arith.addf %664, %665 : vector<2x16xf32>
    %667 = math.tanh %666 : vector<2x16xf32>
    %668 = arith.mulf %663, %667 : vector<2x16xf32>
    %669 = arith.subf %668, %632 : vector<2x16xf32>
    %670 = arith.mulf %641, %669 : vector<2x16xf32>
    %671 = arith.addf %632, %670 : vector<2x16xf32>
    %672 = arith.subf %666, %635 : vector<2x16xf32>
    %673 = arith.mulf %641, %672 : vector<2x16xf32>
    %674 = arith.addf %635, %673 : vector<2x16xf32>
    %675 = vector.extract_strided_slice %346 {offsets = [0, 0], sizes = [1, 8], strides = [1, 1]} : vector<2x16xf32> to vector<1x8xf32>
    %676 = vector.extract_strided_slice %349 {offsets = [0, 0], sizes = [1, 8], strides = [1, 1]} : vector<2x16xf32> to vector<1x8xf32>
    %c0_117 = arith.constant 0 : index
    %c0_118 = arith.constant 0 : index
    %677 = vector.load %arg15[%c0_117, %c0_118] : memref<2x64xf32, #tpu.memory_space<vmem>>, vector<1x8xf32>
    tpu.vector_store %arg15[%c0_117, %c0_118], %675 {strides = array<i32>} : memref<2x64xf32, #tpu.memory_space<vmem>>, vector<1x8xf32>,
    %c0_119 = arith.constant 0 : index
    %c32 = arith.constant 32 : index
    %678 = vector.load %arg15[%c0_119, %c32] : memref<2x64xf32, #tpu.memory_space<vmem>>, vector<1x8xf32>
    tpu.vector_store %arg15[%c0_119, %c32], %676 {strides = array<i32>} : memref<2x64xf32, #tpu.memory_space<vmem>>, vector<1x8xf32>,
    %679 = vector.extract_strided_slice %346 {offsets = [1, 0], sizes = [1, 8], strides = [1, 1]} : vector<2x16xf32> to vector<1x8xf32>
    %680 = vector.extract_strided_slice %349 {offsets = [1, 0], sizes = [1, 8], strides = [1, 1]} : vector<2x16xf32> to vector<1x8xf32>
    %c0_120 = arith.constant 0 : index
    %c8_121 = arith.constant 8 : index
    %681 = vector.load %arg15[%c0_120, %c8_121] : memref<2x64xf32, #tpu.memory_space<vmem>>, vector<1x8xf32>
    tpu.vector_store %arg15[%c0_120, %c8_121], %679 {strides = array<i32>} : memref<2x64xf32, #tpu.memory_space<vmem>>, vector<1x8xf32>,
    %c0_122 = arith.constant 0 : index
    %c40 = arith.constant 40 : index
    %682 = vector.load %arg15[%c0_122, %c40] : memref<2x64xf32, #tpu.memory_space<vmem>>, vector<1x8xf32>
    tpu.vector_store %arg15[%c0_122, %c40], %680 {strides = array<i32>} : memref<2x64xf32, #tpu.memory_space<vmem>>, vector<1x8xf32>,
    %683 = vector.extract_strided_slice %346 {offsets = [0, 8], sizes = [1, 8], strides = [1, 1]} : vector<2x16xf32> to vector<1x8xf32>
    %684 = vector.extract_strided_slice %349 {offsets = [0, 8], sizes = [1, 8], strides = [1, 1]} : vector<2x16xf32> to vector<1x8xf32>
    %c0_123 = arith.constant 0 : index
    %c16 = arith.constant 16 : index
    %685 = vector.load %arg15[%c0_123, %c16] : memref<2x64xf32, #tpu.memory_space<vmem>>, vector<1x8xf32>
    tpu.vector_store %arg15[%c0_123, %c16], %683 {strides = array<i32>} : memref<2x64xf32, #tpu.memory_space<vmem>>, vector<1x8xf32>,
    %c0_124 = arith.constant 0 : index
    %c48 = arith.constant 48 : index
    %686 = vector.load %arg15[%c0_124, %c48] : memref<2x64xf32, #tpu.memory_space<vmem>>, vector<1x8xf32>
    tpu.vector_store %arg15[%c0_124, %c48], %684 {strides = array<i32>} : memref<2x64xf32, #tpu.memory_space<vmem>>, vector<1x8xf32>,
    %687 = vector.extract_strided_slice %346 {offsets = [1, 8], sizes = [1, 8], strides = [1, 1]} : vector<2x16xf32> to vector<1x8xf32>
    %688 = vector.extract_strided_slice %349 {offsets = [1, 8], sizes = [1, 8], strides = [1, 1]} : vector<2x16xf32> to vector<1x8xf32>
    %c0_125 = arith.constant 0 : index
    %c24 = arith.constant 24 : index
    %689 = vector.load %arg15[%c0_125, %c24] : memref<2x64xf32, #tpu.memory_space<vmem>>, vector<1x8xf32>
    tpu.vector_store %arg15[%c0_125, %c24], %687 {strides = array<i32>} : memref<2x64xf32, #tpu.memory_space<vmem>>, vector<1x8xf32>,
    %c0_126 = arith.constant 0 : index
    %c56 = arith.constant 56 : index
    %690 = vector.load %arg15[%c0_126, %c56] : memref<2x64xf32, #tpu.memory_space<vmem>>, vector<1x8xf32>
    tpu.vector_store %arg15[%c0_126, %c56], %688 {strides = array<i32>} : memref<2x64xf32, #tpu.memory_space<vmem>>, vector<1x8xf32>,
    %691 = vector.extract_strided_slice %671 {offsets = [0, 0], sizes = [1, 8], strides = [1, 1]} : vector<2x16xf32> to vector<1x8xf32>
    %692 = vector.extract_strided_slice %674 {offsets = [0, 0], sizes = [1, 8], strides = [1, 1]} : vector<2x16xf32> to vector<1x8xf32>
    %c1 = arith.constant 1 : index
    %c0_127 = arith.constant 0 : index
    %693 = vector.load %arg15[%c1, %c0_127] : memref<2x64xf32, #tpu.memory_space<vmem>>, vector<1x8xf32>
    tpu.vector_store %arg15[%c1, %c0_127], %691 {strides = array<i32>} : memref<2x64xf32, #tpu.memory_space<vmem>>, vector<1x8xf32>,
    %c1_128 = arith.constant 1 : index
    %c32_129 = arith.constant 32 : index
    %694 = vector.load %arg15[%c1_128, %c32_129] : memref<2x64xf32, #tpu.memory_space<vmem>>, vector<1x8xf32>
    tpu.vector_store %arg15[%c1_128, %c32_129], %692 {strides = array<i32>} : memref<2x64xf32, #tpu.memory_space<vmem>>, vector<1x8xf32>,
    %695 = vector.extract_strided_slice %671 {offsets = [1, 0], sizes = [1, 8], strides = [1, 1]} : vector<2x16xf32> to vector<1x8xf32>
    %696 = vector.extract_strided_slice %674 {offsets = [1, 0], sizes = [1, 8], strides = [1, 1]} : vector<2x16xf32> to vector<1x8xf32>
    %c1_130 = arith.constant 1 : index
    %c8_131 = arith.constant 8 : index
    %697 = vector.load %arg15[%c1_130, %c8_131] : memref<2x64xf32, #tpu.memory_space<vmem>>, vector<1x8xf32>
    tpu.vector_store %arg15[%c1_130, %c8_131], %695 {strides = array<i32>} : memref<2x64xf32, #tpu.memory_space<vmem>>, vector<1x8xf32>,
    %c1_132 = arith.constant 1 : index
    %c40_133 = arith.constant 40 : index
    %698 = vector.load %arg15[%c1_132, %c40_133] : memref<2x64xf32, #tpu.memory_space<vmem>>, vector<1x8xf32>
    tpu.vector_store %arg15[%c1_132, %c40_133], %696 {strides = array<i32>} : memref<2x64xf32, #tpu.memory_space<vmem>>, vector<1x8xf32>,
    %699 = vector.extract_strided_slice %671 {offsets = [0, 8], sizes = [1, 8], strides = [1, 1]} : vector<2x16xf32> to vector<1x8xf32>
    %700 = vector.extract_strided_slice %674 {offsets = [0, 8], sizes = [1, 8], strides = [1, 1]} : vector<2x16xf32> to vector<1x8xf32>
    %c1_134 = arith.constant 1 : index
    %c16_135 = arith.constant 16 : index
    %701 = vector.load %arg15[%c1_134, %c16_135] : memref<2x64xf32, #tpu.memory_space<vmem>>, vector<1x8xf32>
    tpu.vector_store %arg15[%c1_134, %c16_135], %699 {strides = array<i32>} : memref<2x64xf32, #tpu.memory_space<vmem>>, vector<1x8xf32>,
    %c1_136 = arith.constant 1 : index
    %c48_137 = arith.constant 48 : index
    %702 = vector.load %arg15[%c1_136, %c48_137] : memref<2x64xf32, #tpu.memory_space<vmem>>, vector<1x8xf32>
    tpu.vector_store %arg15[%c1_136, %c48_137], %700 {strides = array<i32>} : memref<2x64xf32, #tpu.memory_space<vmem>>, vector<1x8xf32>,
    %703 = vector.extract_strided_slice %671 {offsets = [1, 8], sizes = [1, 8], strides = [1, 1]} : vector<2x16xf32> to vector<1x8xf32>
    %704 = vector.extract_strided_slice %674 {offsets = [1, 8], sizes = [1, 8], strides = [1, 1]} : vector<2x16xf32> to vector<1x8xf32>
    %c1_138 = arith.constant 1 : index
    %c24_139 = arith.constant 24 : index
    %705 = vector.load %arg15[%c1_138, %c24_139] : memref<2x64xf32, #tpu.memory_space<vmem>>, vector<1x8xf32>
    tpu.vector_store %arg15[%c1_138, %c24_139], %703 {strides = array<i32>} : memref<2x64xf32, #tpu.memory_space<vmem>>, vector<1x8xf32>,
    %c1_140 = arith.constant 1 : index
    %c56_141 = arith.constant 56 : index
    %706 = vector.load %arg15[%c1_140, %c56_141] : memref<2x64xf32, #tpu.memory_space<vmem>>, vector<1x8xf32>
    tpu.vector_store %arg15[%c1_140, %c56_141], %704 {strides = array<i32>} : memref<2x64xf32, #tpu.memory_space<vmem>>, vector<1x8xf32>,
    %c0_142 = arith.constant 0 : index
    %c0_143 = arith.constant 0 : index
    %707 = vector.load %arg15[%c0_142, %c0_143] : memref<2x64xf32, #tpu.memory_space<vmem>>, vector<2x64xf32>
    %c0_144 = arith.constant 0 : index
    %c0_145 = arith.constant 0 : index
    %708 = vector.load %arg10[%c0_144, %c0_145] : memref<64x32xf32, #tpu.memory_space<vmem>>, vector<64x32xf32>
    %cst_146 = arith.constant dense<0.000000e+00> : vector<2x32xf32>
    %709 = tpu.matmul %707, %708, %cst_146 {dimension_numbers = #tpu.dot_dimension_numbers<[1], [0], [0], [1], [0, 0, 1, 1], [], []>} : vector<2x64xf32>, vector<64x32xf32>, vector<2x32xf32> -> vector<2x32xf32>
    %c0_147 = arith.constant 0 : index
    %c0_148 = arith.constant 0 : index
    %710 = vector.load %arg11[%c0_147, %c0_148] : memref<1x32xf32, #tpu.memory_space<vmem>>, vector<1x32xf32>
    %711 = vector.broadcast %710 : vector<1x32xf32> to vector<2x32xf32>
    %712 = arith.addf %709, %711 : vector<2x32xf32>
    %713 = vector.extract_strided_slice %712 {offsets = [0, 0], sizes = [2, 16], strides = [1, 1]} : vector<2x32xf32> to vector<2x16xf32>
    %714 = vector.extract_strided_slice %712 {offsets = [0, 16], sizes = [2, 16], strides = [1, 1]} : vector<2x32xf32> to vector<2x16xf32>
    %c0_149 = arith.constant 0 : index
    %c0_150 = arith.constant 0 : index
    %715 = vector.load %arg12[%c0_149, %c0_150] : memref<2x16xf32, #tpu.memory_space<vmem>>, vector<2x16xf32>
    tpu.vector_store %arg12[%c0_149, %c0_150], %713 {strides = array<i32>} : memref<2x16xf32, #tpu.memory_space<vmem>>, vector<2x16xf32>,
    %716 = math.exp %714 : vector<2x16xf32>
    %717 = arith.subf %716, %714 : vector<2x16xf32>
    %cst_151 = arith.constant 1.000000e+00 : f32
    %718 = vector.broadcast %cst_151 : f32 to vector<2x16xf32>
    %719 = arith.subf %717, %718 : vector<2x16xf32>
    %720 = arith.mulf %713, %713 : vector<2x16xf32>
    %721 = arith.addf %719, %720 : vector<2x16xf32>
    %722 = vector.shape_cast %721 : vector<2x16xf32> to vector<1x2x16xf32>
    %cst_152 = arith.constant dense<0.000000e+00> : vector<1xf32>
    %723 = vector.multi_reduction <add>, %722, %cst_152 [1, 2] : vector<1x2x16xf32> to vector<1xf32>
    %724 = vector.shape_cast %723 : vector<1xf32> to vector<1x1x1xf32>
    %725 = vector.extract %724[0, 0, 0] : f32 from vector<1x1x1xf32>
    %cst_153 = arith.constant 5.000000e-01 : f32
    %726 = arith.mulf %cst_153, %725 : f32
    %cst_154 = arith.constant 1.000000e+00 : f32
    %727 = vector.broadcast %cst_154 : f32 to vector<1x1xf32>
    %728 = vector.broadcast %726 : f32 to vector<1x1xf32>
    %729 = arith.mulf %728, %727 : vector<1x1xf32>
    %c0_155 = arith.constant 0 : index
    %c0_156 = arith.constant 0 : index
    %730 = vector.load %arg13[%c0_155, %c0_156] : memref<1x1xf32, #tpu.memory_space<vmem>>, vector<1x1xf32>
    tpu.vector_store %arg13[%c0_155, %c0_156], %729 {strides = array<i32>} : memref<1x1xf32, #tpu.memory_space<vmem>>, vector<1x1xf32>,
    return
  }
}

</mosaic_0001>

<bundles_post_ra>
// kernel: tpu_custom_call.1
= control target key start
LH: loop header
LB: loop body
LE: loop exit
PB: predicated region body
PF: predicated region fallthrough
CT: control target
= control target key end

     0   :  { %19 = vsyncpa [#allocation5], 0  ;;  %s3832_s0 = inlined_call_operand.vmem [shape: f32[16,16], index: 0, kind: input, shape index: {}]   ;;  %s3833_s1 = inlined_call_operand.vmem [shape: f32[16,16], index: 1, kind: input, shape index: {}]   ;;  %s3834_s2 = inlined_call_operand.vmem [shape: f32[16,64], index: 2, kind: input, shape index: {}]   ;;  %s3835_s3 = inlined_call_operand.vmem [shape: f32[16,64], index: 3, kind: input, shape index: {}]   ;;  %s3836_s4 = inlined_call_operand.vmem [shape: f32[16,64], index: 4, kind: input, shape index: {}]   ;;  %s3837_s5 = inlined_call_operand.vmem [shape: f32[1,64], index: 5, kind: input, shape index: {}]   ;;  %s3838_s6 = inlined_call_operand.vmem [shape: f32[16,64], index: 6, kind: input, shape index: {}]   ;;  %s3839_s7 = inlined_call_operand.hbm [shape: f32[16,64], index: 7, kind: input, shape index: {}]   ;;  %s3840_s8 = inlined_call_operand.hbm [shape: f32[16,64], index: 8, kind: input, shape index: {}]   ;;  %s3841_s9 = inlined_call_operand.vmem [shape: f32[1,64], index: 9, kind: input, shape index: {}]   ;;  %s3842_s10 = inlined_call_operand.vmem [shape: f32[64,32], index: 10, kind: input, shape index: {}]   ;;  %s3843_s11 = inlined_call_operand.vmem [shape: f32[1,32], index: 11, kind: input, shape index: {}]   ;;  %s3844_s12 = inlined_call_operand.hbm [shape: f32[2,16], index: 12, kind: output, shape index: {0}]   ;;  %s3845_s13 = inlined_call_operand.hbm [shape: f32[1,1], index: 13, kind: output, shape index: {1}]  }
   0x1   :  { %20 = vsyncpa [#allocation8], 0 }
   0x2   :  { %21 = vsyncpa [#allocation6], 0 }
   0x3   :  { %22 = vsyncpa [#allocation11], 0  ;;  %s3292_s25 = smov [#allocation4]   ;;  %s3196_s29 = scalar_lea.hbm %s3839_s7, 256 }
   0x4   :  { %s42_s26 = sshll.u32 %s3292_s25, 4  ;;  %p3197_p0 = scmp.ne.s32.totalorder %s3839_s7, %s3196_s29  ;;  %s43_s26 = int_to_ptr.vmem [resolvable:$true] %s42_s26 }
   0x5   :  { %p3200_p1 = scmp.lt.u32.totalorder %s3196_s29, %s3839_s7 }
   0x7   :  { %p3202_p2 = pnand %p3200_p1, %p3197_p0 }
   0x9   :  { %3205 = shalt.err (!%p3202_p2)
}
   0xa   :  { %s3206_s17 = scalar_lea.vmem %s43_s26, 256  ;;  %p3211_p4 = scmp.lt.s32.totalorder %s43_s26, %s43_s26 }
   0xb   :  { %p3207_p3 = scmp.ne.s32.totalorder %s43_s26, %s3206_s17  ;;  %p3212_p5 = scmp.lt.s32.totalorder %s3206_s17, %s3206_s17 }
   0xd   :  { %p3213_p6 = por %p3212_p5, %p3211_p4 }
   0xf   :  { %p3214_p7 = pnand %p3213_p6, %p3207_p3 }
  0x11   :  { %3217 = shalt.err (!%p3214_p7)
}
  0x12   :  { %s3293_s18 = smov 128   ;;  %s3294_s19 = smov 8  }
  0x13   :  { %48 = dma.hbm_to_vmem [thread:$0]  %s3839_s7, 256, %s43_s26, [#allocation5], %s3293_s18, %s3293_s18, %s3294_s19  }
  0x14   :  { %s3295_s22 = smov [#allocation7]   ;;  %s3218_s27 = scalar_lea.hbm %s3840_s8, 256 }
  0x15   :  { %s54_s23 = sshll.u32 %s3295_s22, 4  ;;  %p3219_p8 = scmp.ne.s32.totalorder %s3840_s8, %s3218_s27  ;;  %s55_s23 = int_to_ptr.vmem [resolvable:$true] %s54_s23 }
  0x16   :  { %p3222_p9 = scmp.lt.u32.totalorder %s3218_s27, %s3840_s8 }
  0x18   :  { %p3224_p10 = pnand %p3222_p9, %p3219_p8 }
  0x1a   :  { %3227 = shalt.err (!%p3224_p10)
}
  0x1b   :  { %s3228_s15 = scalar_lea.vmem %s55_s23, 256  ;;  %p3233_p12 = scmp.lt.s32.totalorder %s55_s23, %s55_s23 }
  0x1c   :  { %p3229_p11 = scmp.ne.s32.totalorder %s55_s23, %s3228_s15  ;;  %p3234_p13 = scmp.lt.s32.totalorder %s3228_s15, %s3228_s15 }
  0x1e   :  { %p3235_p0 = por %p3234_p13, %p3233_p12 }
  0x20   :  { %p3236_p1 = pnand %p3235_p0, %p3229_p11 }
  0x22   :  { %3239 = shalt.err (!%p3236_p1)
}
  0x23   :  { %60 = dma.hbm_to_vmem [thread:$0]  %s3840_s8, 256, %s55_s23, [#allocation8], %s3293_s18, %s3293_s18, %s3294_s19  }
  0x24   :  { %3284 = dma.done.wait [#allocation5], 256  }
  0x25   :  { %3285 = vsyncadd [#allocation5], 4294967040 }
  0x26   :  { %3286 = dma.done.wait [#allocation8], 256  }
  0x27   :  { %3287 = vsyncadd [#allocation8], 4294967040  ;;  %v3296_v0 = vmov 0.0|0.0   ;;  %vm3297_vm0 = vmmov 0   ;;  %v3298_v1 = vmov 0.0   ;;  %vm79_vm1 = vcmask 130048  }
  0x28   :  { %2984 = vmatprep.subr.bf16.mxu0 %v3296_v0  ;;  %2843 = vmatprep.mubr.msk.f32.mxu0 %vm3297_vm0, %v3298_v1  ;;  %v77_v2 = vld [vmem:[%s3834_s2] sm:$0xff]  ;;  %v78_v3 = vld [vmem:[%s3834_s2 + $0x8] sm:$0xff]  ;;  %s3301_s15 = smov 112   ;;  %s3302_s7 = smov 32   ;;  %vm362_vm2 = vcmask 58368   ;;  %vm364_vm3 = vcmask 123968  }
  0x29   :  { %v73_v4 = vld [vmem:[%s3832_s0] sm:$0xff]  ;;  %v2970_v5 = vpack.c.bf16 %v78_v3, %v77_v2  ;;  %v162_v7 = vld [vmem:[%s3835_s3 + $0x8] sm:$0xff]  ;;  %s3303_s17 = smov 80   ;;  %s3304_s20 = smov 48   ;;  %vm2487_vm4 = vcmask 57344   ;;  %vm2493_vm5 = vcmask 319744  }
  0x2a   :  { %2815 = vmatprep.mubr.msk.f32.mxu1 %vm79_vm1, %v73_v4  ;;  %v161_v6 = vld [vmem:[%s3835_s3] sm:$0xff]  ;;  %v240_v10 = vld [vmem:[%s3836_s4 + $0x8] sm:$0xff]  ;;  %s3305_s29 = smov 40   ;;  %vm2499_vm6 = vcmask 123969   ;;  %vm2504_vm7 = vcmask 386369   ;;  %vm2506_vm8 = vcmask 188544  }
  0x2b   :  { %v2974_v8 = vpack.c.bf16 %v162_v7, %v161_v6  ;;  %v239_v9 = vld [vmem:[%s3836_s4] sm:$0xff]  ;;  %2971 = vmatprep.subr.bf16.mxu1 %v2970_v5  ;;  %v74_v12 = vld [vmem:[%s3832_s0 + $0x8] sm:$0xff]  ;;  %s3299_s4 = smov 96   ;;  %vm2508_vm9 = vcmask 450944   ;;  %vm2513_vm10 = vcmask 255169   ;;  %vm2518_vm11 = vcmask 517569  }
  0x2c   :  { %v3429_v11 = vpack.c.bf16 %v240_v10, %v239_v9  ;;  %2973 = vmatpush3.bf16.msra.mxu1 %v2970_v5  ;;  %v2699_v21 = vld [vmem:[%s3837_s5] ss:$0 sm:$0xff]  ;;  %s3300_s5 = smov 16   ;;  %vm2561_vm12 = vcmask 523264   ;;  %vm2635_vm13 = vcmask 123904  }
  0x2d   :  { %2975 = vmatprep.subr.bf16.mxu1 %v2974_v8  ;;  %v3468_v44 = vld [vmem:[%s3833_s1] sm:$0xff] }
  0x2e   :  { %2986 = vmatpush3.bf16.msra.mxu0 %v3429_v11 }
  0x2f   :  { %2990 = vmatprep.subr.bf16.mxu0 %v3296_v0  ;;  %2816 = vmatmul.mubr.msk.f32.vlgmr.msra.gmra.mrb[0].mxu1 %vm79_vm1, %v74_v12 }
  0x30   :  { %2977 = vmatpush3.bf16.msra.mxu1 %v2974_v8  ;;  %2822 = vmatprep.mubr.msk.f32.mxu1 %vm79_vm1, %v73_v4 }
  0x31   :  { %2978 = vmatprep.subr.bf16.mxu1 %v3296_v0 }
  0x33   :  { %2823 = vmatmul.mubr.msk.f32.vlgmr.msra.gmra.mrb[2].mxu1 %vm79_vm1, %v74_v12 }
  0x34   :  { %2980 = vmatpush3.bf16.msra.mxu1 %v3429_v11  ;;  %2829 = vmatprep.mubr.msk.f32.mxu1 %vm3297_vm0, %v3298_v1 }
  0x35   :  { %2981 = vmatprep.subr.bf16.mxu1 %v3296_v0 }
  0x37   :  { %2830 = vmatmul.mubr.f32.vlgmr.msra.gmra.mrb[4].mxu1 %v3298_v1 }
  0x38   :  { %2983 = vmatpush3.bf16.msra.mxu1 %v3429_v11  ;;  %2836 = vmatprep.mubr.msk.f32.mxu1 %vm3297_vm0, %v3298_v1 }
  0x39   :  { %2987 = vmatprep.subr.bf16.mxu1 %v3296_v0 }
 0x102   :  { %v2817_v13 = vpop.f32.mrb[0].mxu1 }
 0x103   :  { %v152_v14 = vpop.f32.mrb[1].mxu1 }
 0x106   :  { %v2824_v15 = vpop.f32.mrb[2].mxu1 }
 0x107   :  { %v242_v16 = vrot.slane %v2824_v15, 6  ;;  %v366_v17 = vrot.slane %v2824_v15, 2  ;;  %v229_v18 = vpop.f32.mrb[3].mxu1 }
 0x108   :  { %v767_v19 = vrot.slane %v229_v18, 6  ;;  %v892_v20 = vrot.slane %v229_v18, 2 }
 0x109   :  { %v244_v22 = vadd.f32 %v242_v16, %v152_v14  ;;  %v368_v23 = vadd.f32 %v366_v17, %v152_v14 }
 0x10a   :  { %v769_v24 = vadd.f32 %v2817_v13, %v767_v19  ;;  %v894_v25 = vadd.f32 %v2817_v13, %v892_v20  ;;  %v321_v26 = vpop.f32.mrb[4].mxu1 }
 0x10b   :  { %v3452_v27 = vadd.f32 %v2699_v21, %v244_v22  ;;  %v2831_v28 = vpop.f32.mrb[5].mxu1  ;;  %v3454_v29 = vadd.f32 %v2699_v21, %v368_v23 }
 0x10c   :  { %v3456_v30 = vadd.f32 %v2699_v21, %v769_v24  ;;  %v3458_v31 = vadd.f32 %v2699_v21, %v894_v25 }
 0x10d   :  { %v325_v32 = vadd.f32 %v321_v26, %v3452_v27 }
 0x10f   :  { %3064 = vtanh.f32 %v325_v32  ;;  %v2700_v34 = vmul.f32 -1.442695, %v325_v32 }
 0x111   :  { %3066 = vpow2.f32 %v2700_v34 }
 0x119   :  { %v3065_v33 = vpop.eup %3064 }
 0x11a   :  { %335 = vrot.lane.b32.xlu0 %v3065_v33, %s3299_s4 }
 0x11b   :  { %v3067_v35 = vpop.eup %3066 }
 0x11c   :  { %v329_v36 = vadd.f32 1.0, %v3067_v35 }
 0x11e   :  { %3068 = vrcp.f32 %v329_v36 }
 0x128   :  { %v3069_v37 = vpop.eup %3068 }
 0x129   :  { %v333_v40 = vmul.f32 0.0, %v3069_v37 }
 0x18c   :  { %v336_v38 = vpop.permute.xlu0 %335 }
 0x18d   :  { %v338_v39 = vmul.f32 %v3069_v37, %v336_v38 }
 0x18f   :  { %340 = vrot.lane.b32.xlu0 %v338_v39, %s3300_s5 }
 0x201   :  { %v341_v41 = vpop.permute.xlu0 %340 }
 0x202   :  { %v343_v42 = vadd.f32 %v341_v41, %v333_v40 }
 0x204   :  { %3070 = vtanh.f32 %v343_v42  ;;  %357 = vrot.lane.b32.xlu0 %v343_v42, %s3301_s15 }
 0x20e   :  { %v3071_v43 = vpop.eup %3070 }
 0x20f   :  { %346 = vrot.lane.b32.xlu1 %v3071_v43, %s3302_s7 }
 0x276   :  { %v358_v45 = vpop.permute.xlu0 %357 }
 0x277   :  { %v360_v46 = vmul.f32 %v358_v45, %v3468_v44 }
 0x279   :  { %v455_v47 = vrot.slane %v360_v46, 6 }
 0x27b   :  { %456 = vrot.lane.b32.xlu0 %v455_v47, %s3300_s5 }
 0x281   :  { %v347_v48 = vpop.permute.xlu1 %346 }
 0x282   :  { %v349_v49 = vmul.f32 %v3069_v37, %v347_v48 }
 0x284   :  { %351 = vrot.lane.b32.xlu1 %v349_v49, %s3303_s17 }
 0x2ed   :  { %v457_v2 = vpop.permute.xlu0 %456 }
 0x2f6   :  { %v352_v50 = vpop.permute.xlu1 %351 }
 0x2f7   :  { %v354_v51 = vmul.f32 %v352_v50, %v3468_v44 }
 0x2f9   :  { %363 = vst.msk [vmem:[#allocation2] sm:$0x3] %vm362_vm2, %v354_v51  ;;  %2837 = vmatmul.mubr.msk.f32.vlgmr.msra.gmra.mrb[6].mxu1 %vm79_vm1, %v354_v51  ;;  %v476_v63 = vrot.slane %v354_v51, 6 }
 0x2fa   :  { %365 = vst.msk [vmem:[#allocation2 + $0xe] sm:$0x3] %vm364_vm3, %v354_v51  ;;  %2989 = vmatpush3.bf16.msra.mxu1 %v3429_v11  ;;  %2850 = vmatprep.mubr.msk.f32.mxu1 %vm3297_vm0, %v3298_v1 }
 0x2fb   :  { %2993 = vmatprep.subr.bf16.mxu1 %v3296_v0 }
 0x3cc   :  { %v439_v52 = vpop.f32.mrb[6].mxu1 }
 0x3cd   :  { %v444_v53 = vrot.slane %v439_v52, 6  ;;  %v2838_v54 = vpop.f32.mrb[7].mxu1 }
 0x3cf   :  { %v446_v55 = vadd.f32 %v444_v53, %v3454_v29 }
 0x3d1   :  { %3072 = vtanh.f32 %v446_v55  ;;  %v2702_v57 = vmul.f32 -1.442695, %v446_v55 }
 0x3d3   :  { %3074 = vpow2.f32 %v2702_v57 }
 0x3db   :  { %v3073_v56 = vpop.eup %3072 }
 0x3dc   :  { %461 = vrot.lane.b32.xlu1 %v3073_v56, %s3299_s4 }
 0x3dd   :  { %v3075_v58 = vpop.eup %3074 }
 0x3de   :  { %v450_v59 = vadd.f32 1.0, %v3075_v58 }
 0x3e0   :  { %3076 = vrcp.f32 %v450_v59 }
 0x3ea   :  { %v3077_v60 = vpop.eup %3076 }
 0x3eb   :  { %v459_v3 = vmul.f32 %v3077_v60, %v457_v2 }
 0x44e   :  { %v462_v61 = vpop.permute.xlu1 %461 }
 0x44f   :  { %v464_v62 = vmul.f32 %v3077_v60, %v462_v61 }
 0x451   :  { %466 = vrot.lane.b32.xlu1 %v464_v62, %s3300_s5 }
 0x455   :  { %477 = vrot.lane.b32.xlu1 %v476_v63, %s3304_s20 }
 0x4c3   :  { %v467_v4 = vpop.permute.xlu1 %466 }
 0x4c4   :  { %v469_v5 = vadd.f32 %v467_v4, %v459_v3 }
 0x4c6   :  { %3078 = vtanh.f32 %v469_v5  ;;  %v490_v6 = vsub.f32 %v469_v5, %v457_v2 }
 0x4c7   :  { %v478_v8 = vpop.permute.xlu1 %477 }
 0x4c8   :  { %492 = vrot.lane.b32.xlu1 %v490_v6, %s3301_s15 }
 0x4d0   :  { %v3079_v7 = vpop.eup %3078 }
 0x4d1   :  { %472 = vrot.lane.b32.xlu0 %v3079_v7, %s3302_s7 }
 0x53a   :  { %v493_v9 = vpop.permute.xlu1 %492 }
 0x53b   :  { %v495_v10 = vmul.f32 %v493_v9, %v3468_v44 }
 0x53d   :  { %v497_v12 = vrot.slane %v495_v10, 2 }
 0x53f   :  { %v499_v13 = vadd.f32 %v497_v12, %v360_v46 }
 0x541   :  { %v587_v14 = vrot.slane %v499_v13, 4 }
 0x543   :  { %588 = vrot.lane.b32.xlu1 %v587_v14, %s3300_s5  ;;  %v473_v15 = vpop.permute.xlu0 %472 }
 0x544   :  { %v475_v16 = vmul.f32 %v3077_v60, %v473_v15 }
 0x546   :  { %v480_v17 = vsub.f32 %v475_v16, %v478_v8 }
 0x548   :  { %482 = vrot.lane.b32.xlu0 %v480_v17, %s3303_s17 }
 0x5b5   :  { %v589_v38 = vpop.permute.xlu1 %588 }
 0x5ba   :  { %v483_v18 = vpop.permute.xlu0 %482 }
 0x5bb   :  { %v485_v19 = vmul.f32 %v483_v18, %v3468_v44 }
 0x5bd   :  { %v487_v20 = vrot.slane %v485_v19, 2 }
 0x5bf   :  { %v489_v21 = vadd.f32 %v487_v20, %v354_v51 }
 0x5c1   :  { %500 = vst.msk [vmem:[#allocation2 + $0x2] sm:$0x3] %vm362_vm2, %v489_v21  ;;  %2844 = vmatmul.mubr.msk.f32.vlgmr.msra.gmra.mrb[0].mxu0 %vm79_vm1, %v489_v21  ;;  %v608_v37 = vrot.slane %v489_v21, 4 }
 0x5c2   :  { %501 = vst.msk [vmem:[#allocation2 + $0xc] sm:$0x3] %vm364_vm3, %v489_v21  ;;  %2992 = vmatpush3.bf16.msra.mxu0 %v3429_v11  ;;  %2857 = vmatprep.mubr.msk.f32.mxu0 %vm3297_vm0, %v3298_v1 }
 0x5c3   :  { %2996 = vmatprep.subr.bf16.mxu0 %v3296_v0 }
 0x694   :  { %v571_v22 = vpop.f32.mrb[0].mxu0 }
 0x695   :  { %v576_v23 = vrot.slane %v571_v22, 4  ;;  %v2845_v24 = vpop.f32.mrb[1].mxu0 }
 0x697   :  { %v578_v25 = vadd.f32 %v576_v23, %v3452_v27 }
 0x699   :  { %3080 = vtanh.f32 %v578_v25  ;;  %v2704_v28 = vmul.f32 -1.442695, %v578_v25 }
 0x69b   :  { %3082 = vpow2.f32 %v2704_v28 }
 0x6a3   :  { %v3081_v26 = vpop.eup %3080 }
 0x6a4   :  { %593 = vrot.lane.b32.xlu0 %v3081_v26, %s3299_s4 }
 0x6a5   :  { %v3083_v32 = vpop.eup %3082 }
 0x6a6   :  { %v582_v33 = vadd.f32 1.0, %v3083_v32 }
 0x6a8   :  { %3084 = vrcp.f32 %v582_v33 }
 0x6b2   :  { %v3085_v34 = vpop.eup %3084 }
 0x6b3   :  { %v591_v39 = vmul.f32 %v3085_v34, %v589_v38 }
 0x716   :  { %v594_v35 = vpop.permute.xlu0 %593 }
 0x717   :  { %v596_v36 = vmul.f32 %v3085_v34, %v594_v35 }
 0x719   :  { %598 = vrot.lane.b32.xlu0 %v596_v36, %s3300_s5 }
 0x71d   :  { %609 = vrot.lane.b32.xlu0 %v608_v37, %s3304_s20 }
 0x78b   :  { %v599_v27 = vpop.permute.xlu0 %598 }
 0x78c   :  { %v601_v40 = vadd.f32 %v599_v27, %v591_v39 }
 0x78e   :  { %3086 = vtanh.f32 %v601_v40  ;;  %v622_v41 = vsub.f32 %v601_v40, %v589_v38 }
 0x78f   :  { %v610_v43 = vpop.permute.xlu0 %609 }
 0x790   :  { %624 = vrot.lane.b32.xlu0 %v622_v41, %s3301_s15 }
 0x798   :  { %v3087_v42 = vpop.eup %3086 }
 0x799   :  { %604 = vrot.lane.b32.xlu1 %v3087_v42, %s3302_s7 }
 0x802   :  { %v625_v45 = vpop.permute.xlu0 %624 }
 0x803   :  { %v627_v46 = vmul.f32 %v625_v45, %v3468_v44 }
 0x805   :  { %v629_v47 = vrot.slane %v627_v46, 4  ;;  %v3540_v46 = vld [vmem:[%s3833_s1 + $0x8] sm:$0xff] }
 0x807   :  { %v631_v48 = vadd.f32 %v629_v47, %v499_v13 }
 0x809   :  { %v719_v49 = vrot.slane %v631_v48, 2 }
 0x80b   :  { %720 = vrot.lane.b32.xlu0 %v719_v49, %s3300_s5  ;;  %v605_v50 = vpop.permute.xlu1 %604 }
 0x80c   :  { %v607_v51 = vmul.f32 %v3085_v34, %v605_v50 }
 0x80e   :  { %v612_v52 = vsub.f32 %v607_v51, %v610_v43 }
 0x810   :  { %614 = vrot.lane.b32.xlu1 %v612_v52, %s3303_s17 }
 0x87d   :  { %v721_v7 = vpop.permute.xlu0 %720 }
 0x882   :  { %v615_v53 = vpop.permute.xlu1 %614 }
 0x883   :  { %v617_v54 = vmul.f32 %v615_v53, %v3468_v44 }
 0x885   :  { %v619_v55 = vrot.slane %v617_v54, 4 }
 0x887   :  { %v621_v56 = vadd.f32 %v619_v55, %v489_v21 }
 0x889   :  { %632 = vst.msk [vmem:[#allocation2 + $0x4] sm:$0x3] %vm362_vm2, %v621_v56  ;;  %2851 = vmatmul.mubr.msk.f32.vlgmr.msra.gmra.mrb[8].mxu1 %vm79_vm1, %v621_v56  ;;  %v740_v6 = vrot.slane %v621_v56, 2 }
 0x88a   :  { %633 = vst.msk [vmem:[#allocation2 + $0xa] sm:$0x3] %vm364_vm3, %v621_v56  ;;  %2995 = vmatpush3.bf16.msra.mxu1 %v3429_v11  ;;  %2864 = vmatprep.mubr.msk.f32.mxu1 %vm3297_vm0, %v3298_v1 }
 0x88b   :  { %2999 = vmatprep.subr.bf16.mxu1 %v3296_v0 }
 0x95c   :  { %v703_v57 = vpop.f32.mrb[8].mxu1 }
 0x95d   :  { %v708_v58 = vrot.slane %v703_v57, 2  ;;  %v2852_v59 = vpop.f32.mrb[9].mxu1 }
 0x95f   :  { %v710_v60 = vadd.f32 %v708_v58, %v3454_v29 }
 0x961   :  { %3088 = vtanh.f32 %v710_v60  ;;  %v2706_v62 = vmul.f32 -1.442695, %v710_v60 }
 0x963   :  { %3090 = vpow2.f32 %v2706_v62 }
 0x96b   :  { %v3089_v61 = vpop.eup %3088 }
 0x96c   :  { %725 = vrot.lane.b32.xlu1 %v3089_v61, %s3299_s4 }
 0x96d   :  { %v3091_v63 = vpop.eup %3090 }
 0x96e   :  { %v714_v2 = vadd.f32 1.0, %v3091_v63 }
 0x970   :  { %3092 = vrcp.f32 %v714_v2 }
 0x97a   :  { %v3093_v3 = vpop.eup %3092 }
 0x97b   :  { %v723_v8 = vmul.f32 %v3093_v3, %v721_v7 }
 0x9de   :  { %v726_v4 = vpop.permute.xlu1 %725 }
 0x9df   :  { %v728_v5 = vmul.f32 %v3093_v3, %v726_v4 }
 0x9e1   :  { %730 = vrot.lane.b32.xlu1 %v728_v5, %s3300_s5 }
 0x9e5   :  { %741 = vrot.lane.b32.xlu1 %v740_v6, %s3304_s20 }
 0xa53   :  { %v731_v29 = vpop.permute.xlu1 %730 }
 0xa54   :  { %v733_v9 = vadd.f32 %v731_v29, %v723_v8 }
 0xa56   :  { %3094 = vtanh.f32 %v733_v9  ;;  %v754_v10 = vsub.f32 %v733_v9, %v721_v7 }
 0xa57   :  { %v742_v13 = vpop.permute.xlu1 %741 }
 0xa58   :  { %756 = vrot.lane.b32.xlu1 %v754_v10, %s3301_s15 }
 0xa60   :  { %v3095_v12 = vpop.eup %3094 }
 0xa61   :  { %736 = vrot.lane.b32.xlu0 %v3095_v12, %s3302_s7 }
 0xaca   :  { %v757_v14 = vpop.permute.xlu1 %756 }
 0xacb   :  { %v759_v15 = vmul.f32 %v757_v14, %v3468_v44 }
 0xacd   :  { %v761_v16 = vrot.slane %v759_v15, 6 }
 0xacf   :  { %v763_v17 = vadd.f32 %v761_v16, %v631_v48 }
 0xad1   :  { %853 = vrot.lane.b32.xlu1 %v763_v17, %s3300_s5 }
 0xad3   :  { %v737_v18 = vpop.permute.xlu0 %736 }
 0xad4   :  { %v739_v19 = vmul.f32 %v3093_v3, %v737_v18 }
 0xad6   :  { %v744_v20 = vsub.f32 %v739_v19, %v742_v13 }
 0xad8   :  { %746 = vrot.lane.b32.xlu0 %v744_v20, %s3303_s17 }
 0xb43   :  { %v854_v39 = vpop.permute.xlu1 %853 }
 0xb4a   :  { %v747_v21 = vpop.permute.xlu0 %746 }
 0xb4b   :  { %v749_v22 = vmul.f32 %v747_v21, %v3468_v44 }
 0xb4d   :  { %v751_v23 = vrot.slane %v749_v22, 6 }
 0xb4f   :  { %v753_v24 = vadd.f32 %v751_v23, %v621_v56 }
 0xb51   :  { %764 = vst.msk [vmem:[#allocation2 + $0x6] sm:$0x3] %vm362_vm2, %v753_v24  ;;  %2858 = vmatmul.mubr.msk.f32.vlgmr.msra.gmra.mrb[2].mxu0 %vm79_vm1, %v753_v24 }
 0xb52   :  { %765 = vst.msk [vmem:[#allocation2 + $0x8] sm:$0x3] %vm364_vm3, %v753_v24  ;;  %2998 = vmatpush3.bf16.msra.mxu0 %v3429_v11  ;;  %2871 = vmatprep.mubr.msk.f32.mxu0 %vm3297_vm0, %v3298_v1 }
 0xc24   :  { %v840_v25 = vpop.f32.mrb[2].mxu0 }
 0xc25   :  { %v844_v26 = vadd.f32 %v840_v25, %v3456_v30  ;;  %v2859_v28 = vpop.f32.mrb[3].mxu0 }
 0xc27   :  { %3096 = vtanh.f32 %v844_v26  ;;  %v2708_v33 = vmul.f32 -1.442695, %v844_v26 }
 0xc29   :  { %3098 = vpow2.f32 %v2708_v33 }
 0xc31   :  { %v3097_v32 = vpop.eup %3096 }
 0xc32   :  { %858 = vrot.lane.b32.xlu0 %v3097_v32, %s3299_s4 }
 0xc33   :  { %v3099_v34 = vpop.eup %3098 }
 0xc34   :  { %v848_v35 = vadd.f32 1.0, %v3099_v34 }
 0xc36   :  { %3100 = vrcp.f32 %v848_v35 }
 0xc40   :  { %v3101_v36 = vpop.eup %3100 }
 0xc41   :  { %v856_v27 = vmul.f32 %v3101_v36, %v854_v39 }
 0xca4   :  { %v859_v37 = vpop.permute.xlu0 %858 }
 0xca5   :  { %v861_v38 = vmul.f32 %v3101_v36, %v859_v37 }
 0xca7   :  { %863 = vrot.lane.b32.xlu0 %v861_v38, %s3300_s5 }
 0xcab   :  { %873 = vrot.lane.b32.xlu0 %v753_v24, %s3304_s20 }
 0xd19   :  { %v864_v40 = vpop.permute.xlu0 %863 }
 0xd1a   :  { %v866_v41 = vadd.f32 %v864_v40, %v856_v27 }
 0xd1c   :  { %3102 = vtanh.f32 %v866_v41  ;;  %v883_v42 = vsub.f32 %v866_v41, %v854_v39 }
 0xd1d   :  { %v874_v45 = vpop.permute.xlu0 %873 }
 0xd1e   :  { %885 = vrot.lane.b32.xlu0 %v883_v42, %s3301_s15 }
 0xd26   :  { %v3103_v43 = vpop.eup %3102 }
 0xd27   :  { %869 = vrot.lane.b32.xlu1 %v3103_v43, %s3302_s7 }
 0xd90   :  { %v886_v47 = vpop.permute.xlu0 %885 }
 0xd91   :  { %v888_v48 = vmul.f32 %v886_v47, %v3540_v46 }
 0xd93   :  { %v889_v49 = vadd.f32 %v888_v48, %v763_v17 }
 0xd95   :  { %v981_v50 = vrot.slane %v889_v49, 6 }
 0xd97   :  { %982 = vrot.lane.b32.xlu0 %v981_v50, %s3300_s5 }
 0xd99   :  { %v870_v51 = vpop.permute.xlu1 %869 }
 0xd9a   :  { %v872_v52 = vmul.f32 %v3101_v36, %v870_v51 }
 0xd9c   :  { %v876_v53 = vsub.f32 %v872_v52, %v874_v45 }
 0xd9e   :  { %878 = vrot.lane.b32.xlu1 %v876_v53, %s3303_s17 }
 0xe09   :  { %v983_v6 = vpop.permute.xlu0 %982 }
 0xe10   :  { %v879_v54 = vpop.permute.xlu1 %878 }
 0xe11   :  { %v881_v55 = vmul.f32 %v879_v54, %v3540_v46 }
 0xe13   :  { %v882_v56 = vadd.f32 %v881_v55, %v753_v24 }
 0xe15   :  { %890 = vst.msk [vmem:[#allocation2 + $0x8] sm:$0x3] %vm362_vm2, %v882_v56  ;;  %2865 = vmatmul.mubr.msk.f32.vlgmr.msra.gmra.mrb[10].mxu1 %vm79_vm1, %v882_v56  ;;  %v1002_v5 = vrot.slane %v882_v56, 6 }
 0xe16   :  { %891 = vst.msk [vmem:[#allocation2 + $0x6] sm:$0x3] %vm364_vm3, %v882_v56  ;;  %3001 = vmatpush3.bf16.msra.mxu1 %v3429_v11  ;;  %2878 = vmatprep.mubr.msk.f32.mxu1 %vm3297_vm0, %v3298_v1 }
 0xee8   :  { %v965_v57 = vpop.f32.mrb[10].mxu1 }
 0xee9   :  { %v970_v58 = vrot.slane %v965_v57, 6  ;;  %v2866_v59 = vpop.f32.mrb[11].mxu1 }
 0xeeb   :  { %v972_v60 = vadd.f32 %v970_v58, %v3458_v31 }
 0xeed   :  { %3104 = vtanh.f32 %v972_v60  ;;  %v2710_v62 = vmul.f32 -1.442695, %v972_v60 }
 0xeef   :  { %3106 = vpow2.f32 %v2710_v62 }
 0xef7   :  { %v3105_v61 = vpop.eup %3104 }
 0xef8   :  { %987 = vrot.lane.b32.xlu1 %v3105_v61, %s3299_s4 }
 0xef9   :  { %v3107_v63 = vpop.eup %3106 }
 0xefa   :  { %v976_v2 = vadd.f32 1.0, %v3107_v63 }
 0xefc   :  { %3108 = vrcp.f32 %v976_v2 }
 0xf06   :  { %v3109_v3 = vpop.eup %3108 }
 0xf07   :  { %v985_v7 = vmul.f32 %v3109_v3, %v983_v6 }
 0xf6a   :  { %v988_v4 = vpop.permute.xlu1 %987 }
 0xf6b   :  { %v990_v11 = vmul.f32 %v3109_v3, %v988_v4 }
 0xf6d   :  { %992 = vrot.lane.b32.xlu1 %v990_v11, %s3300_s5 }
 0xf71   :  { %1003 = vrot.lane.b32.xlu1 %v1002_v5, %s3304_s20 }
 0xfdf   :  { %v993_v8 = vpop.permute.xlu1 %992 }
 0xfe0   :  { %v995_v29 = vadd.f32 %v993_v8, %v985_v7 }
 0xfe2   :  { %3110 = vtanh.f32 %v995_v29  ;;  %v1016_v9 = vsub.f32 %v995_v29, %v983_v6 }
 0xfe3   :  { %v1004_v12 = vpop.permute.xlu1 %1003 }
 0xfe4   :  { %1018 = vrot.lane.b32.xlu1 %v1016_v9, %s3301_s15 }
 0xfec   :  { %v3111_v10 = vpop.eup %3110 }
 0xfed   :  { %998 = vrot.lane.b32.xlu0 %v3111_v10, %s3302_s7 }
0x1056   :  { %v1019_v13 = vpop.permute.xlu1 %1018 }
0x1057   :  { %v1021_v14 = vmul.f32 %v1019_v13, %v3540_v46  ;;  %v1294_v13 = vld [vmem:[%s3838_s6] sm:$0xff] }
0x1059   :  { %v1023_v15 = vrot.slane %v1021_v14, 2  ;;  %v1295_v14 = vld [vmem:[%s3838_s6 + $0x8] sm:$0xff] }
0x105b   :  { %v1025_v16 = vadd.f32 %v1023_v15, %v889_v49  ;;  %v1377_v15 = vld [vmem:[#allocation4] sm:$0xff] }
0x105d   :  { %v1113_v17 = vrot.slane %v1025_v16, 4 }
0x105f   :  { %1114 = vrot.lane.b32.xlu1 %v1113_v17, %s3300_s5  ;;  %v999_v18 = vpop.permute.xlu0 %998  ;;  %v1378_v17 = vld [vmem:[#allocation4 + $0x8] sm:$0xff] }
0x1060   :  { %v1001_v19 = vmul.f32 %v3109_v3, %v999_v18 }
0x1062   :  { %v1006_v20 = vsub.f32 %v1001_v19, %v1004_v12  ;;  %v3006_v19 = vpack.c.bf16 %v1378_v17, %v1377_v15 }
0x1064   :  { %1008 = vrot.lane.b32.xlu0 %v1006_v20, %s3303_s17  ;;  %3007 = vmatprep.subr.bf16.mxu1 %v3006_v19 }
0x10d1   :  { %v1115_v40 = vpop.permute.xlu1 %1114 }
0x10d6   :  { %v1009_v21 = vpop.permute.xlu0 %1008 }
0x10d7   :  { %v1011_v22 = vmul.f32 %v1009_v21, %v3540_v46 }
0x10d9   :  { %v1013_v23 = vrot.slane %v1011_v22, 2 }
0x10db   :  { %v1015_v24 = vadd.f32 %v1013_v23, %v882_v56 }
0x10dd   :  { %1026 = vst.msk [vmem:[#allocation2 + $0xa] sm:$0x3] %vm362_vm2, %v1015_v24  ;;  %2872 = vmatmul.mubr.msk.f32.vlgmr.msra.gmra.mrb[4].mxu0 %vm79_vm1, %v1015_v24  ;;  %v1134_v27 = vrot.slane %v1015_v24, 4 }
0x10de   :  { %1027 = vst.msk [vmem:[#allocation2 + $0x4] sm:$0x3] %vm364_vm3, %v1015_v24 }
0x11b0   :  { %v1097_v25 = vpop.f32.mrb[4].mxu0 }
0x11b1   :  { %v1102_v26 = vrot.slane %v1097_v25, 4  ;;  %v2873_v28 = vpop.f32.mrb[5].mxu0 }
0x11b2   :  { %v1455_v28 = vld [vmem:[#allocation7] sm:$0xff] }
0x11b3   :  { %v1104_v32 = vadd.f32 %v1102_v26, %v3456_v30 }
0x11b5   :  { %3112 = vtanh.f32 %v1104_v32  ;;  %v2712_v34 = vmul.f32 -1.442695, %v1104_v32  ;;  %v1456_v32 = vld [vmem:[#allocation7 + $0x8] sm:$0xff] }
0x11b7   :  { %3114 = vpow2.f32 %v2712_v34 }
0x11bf   :  { %v3113_v33 = vpop.eup %3112 }
0x11c0   :  { %1119 = vrot.lane.b32.xlu0 %v3113_v33, %s3299_s4  ;;  %v3610_v33 = vpack.c.bf16 %v1456_v32, %v1455_v28 }
0x11c1   :  { %v3115_v35 = vpop.eup %3114 }
0x11c2   :  { %v1108_v36 = vadd.f32 1.0, %v3115_v35 }
0x11c4   :  { %3116 = vrcp.f32 %v1108_v36 }
0x11ce   :  { %v3117_v37 = vpop.eup %3116 }
0x11cf   :  { %v1117_v41 = vmul.f32 %v3117_v37, %v1115_v40 }
0x1232   :  { %v1120_v38 = vpop.permute.xlu0 %1119 }
0x1233   :  { %v1122_v39 = vmul.f32 %v3117_v37, %v1120_v38 }
0x1235   :  { %1124 = vrot.lane.b32.xlu0 %v1122_v39, %s3300_s5 }
0x1239   :  { %1135 = vrot.lane.b32.xlu0 %v1134_v27, %s3304_s20 }
0x12a7   :  { %v1125_v30 = vpop.permute.xlu0 %1124 }
0x12a8   :  { %v1127_v42 = vadd.f32 %v1125_v30, %v1117_v41  ;;  %v2719_v41 = vld [vmem:[%s3841_s9] ss:$0 sm:$0xff] }
0x12aa   :  { %3118 = vtanh.f32 %v1127_v42  ;;  %v1148_v43 = vsub.f32 %v1127_v42, %v1115_v40 }
0x12ab   :  { %v1136_v47 = vpop.permute.xlu0 %1135 }
0x12ac   :  { %1150 = vrot.lane.b32.xlu0 %v1148_v43, %s3301_s15 }
0x12b4   :  { %v3119_v45 = vpop.eup %3118 }
0x12b5   :  { %1130 = vrot.lane.b32.xlu1 %v3119_v45, %s3302_s7 }
0x131e   :  { %v1151_v48 = vpop.permute.xlu0 %1150 }
0x131f   :  { %v1153_v49 = vmul.f32 %v1151_v48, %v3540_v46 }
0x1321   :  { %v1155_v50 = vrot.slane %v1153_v49, 4 }
0x1323   :  { %v3572_v51 = vadd.f32 %v1155_v50, %v1025_v16  ;;  %v3002_v16 = vpack.c.bf16 %v1295_v14, %v1294_v13 }
0x1325   :  { %v1245_v52 = vrot.slane %v3572_v51, 2  ;;  %3003 = vmatprep.subr.bf16.mxu0 %v3002_v16 }
0x1326   :  { %3005 = vmatpush3.bf16.msra.mxu0 %v3002_v16 }
0x1327   :  { %1246 = vrot.lane.b32.xlu0 %v1245_v52, %s3300_s5  ;;  %v1131_v53 = vpop.permute.xlu1 %1130  ;;  %3010 = vmatprep.subr.bf16.mxu0 %v3296_v0 }
0x1328   :  { %v1133_v54 = vmul.f32 %v3117_v37, %v1131_v53 }
0x132a   :  { %v1138_v55 = vsub.f32 %v1133_v54, %v1136_v47 }
0x132c   :  { %1140 = vrot.lane.b32.xlu1 %v1138_v55, %s3303_s17 }
0x1399   :  { %v3585_v29 = vpop.permute.xlu0 %1246 }
0x139e   :  { %v1141_v56 = vpop.permute.xlu1 %1140 }
0x139f   :  { %v1143_v57 = vmul.f32 %v1141_v56, %v3540_v46 }
0x13a1   :  { %v1145_v58 = vrot.slane %v1143_v57, 4 }
0x13a3   :  { %v1147_v59 = vadd.f32 %v1145_v58, %v1015_v24 }
0x13a5   :  { %1158 = vst.msk [vmem:[#allocation2 + $0xc] sm:$0x3] %vm362_vm2, %v1147_v59  ;;  %2879 = vmatmul.mubr.msk.f32.vlgmr.msra.gmra.mrb[12].mxu1 %vm79_vm1, %v1147_v59  ;;  %v1266_v8 = vrot.slane %v1147_v59, 2 }
0x13a6   :  { %1159 = vst.msk [vmem:[#allocation2 + $0x2] sm:$0x3] %vm364_vm3, %v1147_v59  ;;  %3009 = vmatpush3.bf16.msra.mxu1 %v3006_v19 }
0x13a7   :  { %3013 = vmatprep.subr.bf16.mxu1 %v3296_v0 }
0x1478   :  { %v1229_v60 = vpop.f32.mrb[12].mxu1 }
0x1479   :  { %v1234_v61 = vrot.slane %v1229_v60, 2  ;;  %v2880_v62 = vpop.f32.mrb[13].mxu1 }
0x147b   :  { %v1236_v63 = vadd.f32 %v1234_v61, %v3458_v31 }
0x147d   :  { %3120 = vtanh.f32 %v1236_v63  ;;  %v2714_v3 = vmul.f32 -1.442695, %v1236_v63 }
0x147f   :  { %3122 = vpow2.f32 %v2714_v3 }
0x1487   :  { %v3121_v2 = vpop.eup %3120 }
0x1488   :  { %1251 = vrot.lane.b32.xlu1 %v3121_v2, %s3299_s4 }
0x1489   :  { %v3123_v4 = vpop.eup %3122 }
0x148a   :  { %v1240_v11 = vadd.f32 1.0, %v3123_v4 }
0x148c   :  { %3124 = vrcp.f32 %v1240_v11 }
0x1496   :  { %v3125_v5 = vpop.eup %3124 }
0x1497   :  { %v1249_v31 = vmul.f32 %v3125_v5, %v3585_v29 }
0x14fa   :  { %v1252_v6 = vpop.permute.xlu1 %1251 }
0x14fb   :  { %v1254_v7 = vmul.f32 %v3125_v5, %v1252_v6 }
0x14fd   :  { %1256 = vrot.lane.b32.xlu1 %v1254_v7, %s3300_s5 }
0x1501   :  { %1267 = vrot.lane.b32.xlu1 %v1266_v8, %s3304_s20 }
0x156f   :  { %v1257_v9 = vpop.permute.xlu1 %1256 }
0x1570   :  { %v3588_v10 = vadd.f32 %v1257_v9, %v1249_v31 }
0x1572   :  { %3126 = vtanh.f32 %v3588_v10 }
0x1573   :  { %v1268_v21 = vpop.permute.xlu1 %1267 }
0x157c   :  { %v3127_v12 = vpop.eup %3126 }
0x157d   :  { %1262 = vrot.lane.b32.xlu0 %v3127_v12, %s3302_s7 }
0x15ef   :  { %v1263_v18 = vpop.permute.xlu0 %1262 }
0x15f0   :  { %v1265_v20 = vmul.f32 %v3125_v5, %v1263_v18 }
0x15f2   :  { %v1270_v22 = vsub.f32 %v1265_v20, %v1268_v21 }
0x15f4   :  { %1272 = vrot.lane.b32.xlu0 %v1270_v22, %s3303_s17 }
0x1666   :  { %v1273_v23 = vpop.permute.xlu0 %1272 }
0x1667   :  { %v1275_v24 = vmul.f32 %v1273_v23, %v3540_v46 }
0x1669   :  { %v1277_v25 = vrot.slane %v1275_v24, 6 }
0x166b   :  { %v3602_v26 = vadd.f32 %v1277_v25, %v1147_v59 }
0x166d   :  { %1290 = vst.msk [vmem:[#allocation2 + $0xe] sm:$0x3] %vm362_vm2, %v3602_v26 }
0x166e   :  { %1291 = vst.msk [vmem:[#allocation2] sm:$0x3] %vm364_vm3, %v3602_v26 }
0x166f   :  { %2488 = vst.msk [vmem:[#allocation3] sm:$0x1] %vm2487_vm4, %v3602_v26 }
0x1674   :  { %v1293_v35 = vld [vmem:[#allocation2 + $0x8] sm:$0xff] }
0x1675   :  { %v1292_v34 = vld [vmem:[#allocation2] sm:$0xff] }
0x1676   :  { %2885 = vmatprep.mubr.msk.f32.mxu0 %vm79_vm1, %v1292_v34  ;;  %2892 = vmatprep.mubr.msk.f32.mxu1 %vm79_vm1, %v1292_v34 }
0x1677   :  { %2886 = vmatmul.mubr.msk.f32.vlgmr.msra.gmra.mrb[6].mxu0 %vm79_vm1, %v1293_v35  ;;  %2893 = vmatmul.mubr.msk.f32.vlgmr.msra.gmra.mrb[14].mxu1 %vm79_vm1, %v1293_v35 }
0x1678   :  { %3012 = vmatpush3.bf16.msra.mxu0 %v3610_v33  ;;  %2899 = vmatprep.mubr.msk.f32.mxu0 %vm3297_vm0, %v3298_v1 }
0x1679   :  { %3015 = vmatpush3.bf16.msra.mxu1 %v3610_v33  ;;  %2906 = vmatprep.mubr.msk.f32.mxu1 %vm3297_vm0, %v3298_v1 }
0x167a   :  { %3016 = vmatprep.subr.bf16.mxu0 %v3296_v0  ;;  %3019 = vmatprep.subr.bf16.mxu1 %v3296_v0 }
0x167b   :  { %2900 = vmatmul.mubr.f32.vlgmr.msra.gmra.mrb[8].mxu0 %v3298_v1 }
0x167c   :  { %3018 = vmatpush3.bf16.msra.mxu0 %v3610_v33  ;;  %2913 = vmatprep.mubr.msk.f32.mxu0 %vm3297_vm0, %v3298_v1 }
0x167d   :  { %3022 = vmatprep.subr.bf16.mxu0 %v3296_v0 }
0x174a   :  { %v2887_v36 = vpop.f32.mrb[6].mxu0  ;;  %v2894_v37 = vpop.f32.mrb[14].mxu1 }
0x174b   :  { %v1458_v38 = vrot.slane %v2894_v37, 6  ;;  %v1575_v39 = vrot.slane %v2894_v37, 2  ;;  %v1368_v27 = vpop.f32.mrb[7].mxu0  ;;  %v1445_v40 = vpop.f32.mrb[15].mxu1 }
0x174c   :  { %v1970_v30 = vrot.slane %v1445_v40, 6  ;;  %v2093_v42 = vrot.slane %v1445_v40, 2 }
0x174d   :  { %v1460_v43 = vadd.f32 %v1458_v38, %v1368_v27  ;;  %v1577_v45 = vadd.f32 %v1575_v39, %v1368_v27 }
0x174e   :  { %v1972_v47 = vadd.f32 %v2887_v36, %v1970_v30  ;;  %v2095_v48 = vadd.f32 %v2887_v36, %v2093_v42  ;;  %v1534_v49 = vpop.f32.mrb[8].mxu0 }
0x174f   :  { %v3632_v50 = vadd.f32 %v2719_v41, %v1577_v45  ;;  %v3634_v52 = vadd.f32 %v2719_v41, %v1460_v43  ;;  %v2901_v53 = vpop.f32.mrb[9].mxu0 }
0x1750   :  { %v3636_v54 = vadd.f32 %v2719_v41, %v1972_v47  ;;  %v3638_v55 = vadd.f32 %v2719_v41, %v2095_v48 }
0x1751   :  { %v1538_v56 = vadd.f32 %v1534_v49, %v3634_v52 }
0x1753   :  { %3128 = vtanh.f32 %v1538_v56  ;;  %v2720_v58 = vmul.f32 -1.442695, %v1538_v56 }
0x1755   :  { %3130 = vpow2.f32 %v2720_v58 }
0x175d   :  { %v3129_v57 = vpop.eup %3128 }
0x175e   :  { %1548 = vrot.lane.b32.xlu1 %v3129_v57, %s3299_s4 }
0x175f   :  { %v3131_v59 = vpop.eup %3130 }
0x1760   :  { %v1542_v60 = vadd.f32 1.0, %v3131_v59 }
0x1762   :  { %3132 = vrcp.f32 %v1542_v60 }
0x176c   :  { %v3133_v61 = vpop.eup %3132 }
0x176d   :  { %v1546_v2 = vmul.f32 0.0, %v3133_v61 }
0x17d0   :  { %v1549_v62 = vpop.permute.xlu1 %1548 }
0x17d1   :  { %v1551_v63 = vmul.f32 %v3133_v61, %v1549_v62 }
0x17d3   :  { %1553 = vrot.lane.b32.xlu0 %v1551_v63, %s3300_s5 }
0x1845   :  { %v1554_v3 = vpop.permute.xlu0 %1553 }
0x1846   :  { %v1556_v4 = vadd.f32 %v1554_v3, %v1546_v2 }
0x1848   :  { %3134 = vtanh.f32 %v1556_v4 }
0x1852   :  { %v3135_v11 = vpop.eup %3134 }
0x1853   :  { %1559 = vrot.lane.b32.xlu1 %v3135_v11, %s3302_s7 }
0x1857   :  { %1570 = vrot.lane.b32.xlu1 %v1556_v4, %s3301_s15 }
0x18c5   :  { %v1560_v5 = vpop.permute.xlu1 %1559 }
0x18c6   :  { %v1562_v6 = vmul.f32 %v3133_v61, %v1560_v5 }
0x18c8   :  { %1564 = vrot.lane.b32.xlu0 %v1562_v6, %s3303_s17 }
0x18c9   :  { %v1571_v7 = vpop.permute.xlu1 %1570 }
0x18ca   :  { %v1573_v8 = vmul.f32 %v1571_v7, %v3468_v44 }
0x18cc   :  { %v1664_v31 = vrot.slane %v1573_v8, 6 }
0x18ce   :  { %1665 = vrot.lane.b32.xlu1 %v1664_v31, %s3300_s5 }
0x193a   :  { %v1565_v9 = vpop.permute.xlu0 %1564 }
0x193b   :  { %v1567_v12 = vmul.f32 %v1565_v9, %v3468_v44 }
0x193d   :  { %2907 = vmatmul.mubr.msk.f32.vlgmr.msra.gmra.mrb[16].mxu1 %vm79_vm1, %v1567_v12  ;;  %v1685_v24 = vrot.slane %v1567_v12, 6 }
0x193e   :  { %3021 = vmatpush3.bf16.msra.mxu1 %v3610_v33  ;;  %2920 = vmatprep.mubr.msk.f32.mxu1 %vm3297_vm0, %v3298_v1 }
0x193f   :  { %3025 = vmatprep.subr.bf16.mxu1 %v3296_v0 }
0x1940   :  { %v1666_v25 = vpop.permute.xlu1 %1665 }
0x1a10   :  { %v1648_v13 = vpop.f32.mrb[16].mxu1 }
0x1a11   :  { %v1653_v14 = vrot.slane %v1648_v13, 6  ;;  %v2908_v15 = vpop.f32.mrb[17].mxu1 }
0x1a13   :  { %v1655_v16 = vadd.f32 %v1653_v14, %v3632_v50 }
0x1a15   :  { %3136 = vtanh.f32 %v1655_v16  ;;  %v2722_v18 = vmul.f32 -1.442695, %v1655_v16 }
0x1a17   :  { %3138 = vpow2.f32 %v2722_v18 }
0x1a1f   :  { %v3137_v17 = vpop.eup %3136 }
0x1a20   :  { %1670 = vrot.lane.b32.xlu0 %v3137_v17, %s3299_s4 }
0x1a21   :  { %v3139_v19 = vpop.eup %3138 }
0x1a22   :  { %v1659_v20 = vadd.f32 1.0, %v3139_v19 }
0x1a24   :  { %3140 = vrcp.f32 %v1659_v20 }
0x1a2e   :  { %v3141_v21 = vpop.eup %3140 }
0x1a2f   :  { %v1668_v28 = vmul.f32 %v3141_v21, %v1666_v25 }
0x1a92   :  { %v1671_v22 = vpop.permute.xlu0 %1670 }
0x1a93   :  { %v1673_v23 = vmul.f32 %v3141_v21, %v1671_v22 }
0x1a95   :  { %1675 = vrot.lane.b32.xlu0 %v1673_v23, %s3300_s5 }
0x1a99   :  { %1686 = vrot.lane.b32.xlu0 %v1685_v24, %s3304_s20 }
0x1b07   :  { %v1676_v32 = vpop.permute.xlu0 %1675 }
0x1b08   :  { %v1678_v34 = vadd.f32 %v1676_v32, %v1668_v28 }
0x1b0a   :  { %3142 = vtanh.f32 %v1678_v34  ;;  %v1699_v35 = vsub.f32 %v1678_v34, %v1666_v25 }
0x1b0b   :  { %v1687_v37 = vpop.permute.xlu0 %1686 }
0x1b0c   :  { %1701 = vrot.lane.b32.xlu0 %v1699_v35, %s3301_s15 }
0x1b14   :  { %v3143_v36 = vpop.eup %3142 }
0x1b15   :  { %1681 = vrot.lane.b32.xlu1 %v3143_v36, %s3302_s7 }
0x1b7e   :  { %v1702_v38 = vpop.permute.xlu0 %1701 }
0x1b7f   :  { %v1704_v39 = vmul.f32 %v1702_v38, %v3468_v44 }
0x1b81   :  { %v1706_v27 = vrot.slane %v1704_v39, 2 }
0x1b83   :  { %v1708_v40 = vadd.f32 %v1706_v27, %v1573_v8 }
0x1b85   :  { %v1794_v41 = vrot.slane %v1708_v40, 4 }
0x1b87   :  { %1795 = vrot.lane.b32.xlu0 %v1794_v41, %s3300_s5  ;;  %v1682_v30 = vpop.permute.xlu1 %1681 }
0x1b88   :  { %v1684_v42 = vmul.f32 %v3141_v21, %v1682_v30 }
0x1b8a   :  { %v1689_v43 = vsub.f32 %v1684_v42, %v1687_v37 }
0x1b8c   :  { %1691 = vrot.lane.b32.xlu1 %v1689_v43, %s3303_s17 }
0x1bf9   :  { %v1796_v11 = vpop.permute.xlu0 %1795 }
0x1bfe   :  { %v1692_v45 = vpop.permute.xlu1 %1691 }
0x1bff   :  { %v1694_v47 = vmul.f32 %v1692_v45, %v3468_v44 }
0x1c01   :  { %v1696_v48 = vrot.slane %v1694_v47, 2  ;;  %v3194_v47 = vld [vmem:[%s3833_s1] sm:$0xff] }
0x1c03   :  { %v1698_v49 = vadd.f32 %v1696_v48, %v1567_v12 }
0x1c05   :  { %2914 = vmatmul.mubr.msk.f32.vlgmr.msra.gmra.mrb[10].mxu0 %vm79_vm1, %v1698_v49  ;;  %v1815_v4 = vrot.slane %v1698_v49, 4 }
0x1c06   :  { %3024 = vmatpush3.bf16.msra.mxu0 %v3610_v33  ;;  %2927 = vmatprep.mubr.msk.f32.mxu0 %vm3297_vm0, %v3298_v1 }
0x1c07   :  { %3028 = vmatprep.subr.bf16.mxu0 %v3296_v0 }
0x1cd8   :  { %v1778_v53 = vpop.f32.mrb[10].mxu0 }
0x1cd9   :  { %v1783_v56 = vrot.slane %v1778_v53, 4  ;;  %v2915_v57 = vpop.f32.mrb[11].mxu0 }
0x1cdb   :  { %v1785_v58 = vadd.f32 %v1783_v56, %v3634_v52 }
0x1cdd   :  { %3144 = vtanh.f32 %v1785_v58  ;;  %v2724_v60 = vmul.f32 -1.442695, %v1785_v58 }
0x1cdf   :  { %3146 = vpow2.f32 %v2724_v60 }
0x1ce7   :  { %v3145_v59 = vpop.eup %3144 }
0x1ce8   :  { %1800 = vrot.lane.b32.xlu1 %v3145_v59, %s3299_s4 }
0x1ce9   :  { %v3147_v61 = vpop.eup %3146 }
0x1cea   :  { %v1789_v62 = vadd.f32 1.0, %v3147_v61 }
0x1cec   :  { %3148 = vrcp.f32 %v1789_v62 }
0x1cf6   :  { %v3149_v63 = vpop.eup %3148 }
0x1cf7   :  { %v1798_v5 = vmul.f32 %v3149_v63, %v1796_v11 }
0x1d5a   :  { %v1801_v2 = vpop.permute.xlu1 %1800 }
0x1d5b   :  { %v1803_v3 = vmul.f32 %v3149_v63, %v1801_v2 }
0x1d5d   :  { %1805 = vrot.lane.b32.xlu1 %v1803_v3, %s3300_s5 }
0x1d61   :  { %1816 = vrot.lane.b32.xlu1 %v1815_v4, %s3304_s20 }
0x1dcf   :  { %v1806_v52 = vpop.permute.xlu1 %1805 }
0x1dd0   :  { %v1808_v6 = vadd.f32 %v1806_v52, %v1798_v5 }
0x1dd2   :  { %3150 = vtanh.f32 %v1808_v6  ;;  %v1829_v7 = vsub.f32 %v1808_v6, %v1796_v11 }
0x1dd3   :  { %v1817_v31 = vpop.permute.xlu1 %1816 }
0x1dd4   :  { %1831 = vrot.lane.b32.xlu1 %v1829_v7, %s3301_s15 }
0x1ddc   :  { %v3151_v8 = vpop.eup %3150 }
0x1ddd   :  { %1811 = vrot.lane.b32.xlu0 %v3151_v8, %s3302_s7 }
0x1e46   :  { %v1832_v9 = vpop.permute.xlu1 %1831 }
0x1e47   :  { %v1834_v12 = vmul.f32 %v1832_v9, %v3468_v44 }
0x1e49   :  { %v1836_v13 = vrot.slane %v1834_v12, 4 }
0x1e4b   :  { %v1838_v14 = vadd.f32 %v1836_v13, %v1708_v40 }
0x1e4d   :  { %v1924_v15 = vrot.slane %v1838_v14, 2 }
0x1e4f   :  { %1925 = vrot.lane.b32.xlu1 %v1924_v15, %s3300_s5  ;;  %v1812_v16 = vpop.permute.xlu0 %1811 }
0x1e50   :  { %v1814_v17 = vmul.f32 %v3149_v63, %v1812_v16 }
0x1e52   :  { %v1819_v18 = vsub.f32 %v1814_v17, %v1817_v31 }
0x1e54   :  { %1821 = vrot.lane.b32.xlu0 %v1819_v18, %s3303_s17 }
0x1ec1   :  { %v1926_v27 = vpop.permute.xlu1 %1925 }
0x1ec6   :  { %v1822_v19 = vpop.permute.xlu0 %1821 }
0x1ec7   :  { %v1824_v20 = vmul.f32 %v1822_v19, %v3468_v44 }
0x1ec9   :  { %v1826_v21 = vrot.slane %v1824_v20, 4 }
0x1ecb   :  { %v1828_v22 = vadd.f32 %v1826_v21, %v1698_v49 }
0x1ecd   :  { %2921 = vmatmul.mubr.msk.f32.vlgmr.msra.gmra.mrb[18].mxu1 %vm79_vm1, %v1828_v22  ;;  %v1945_v39 = vrot.slane %v1828_v22, 2 }
0x1ece   :  { %3027 = vmatpush3.bf16.msra.mxu1 %v3610_v33  ;;  %2934 = vmatprep.mubr.msk.f32.mxu1 %vm3297_vm0, %v3298_v1 }
0x1ecf   :  { %3031 = vmatprep.subr.bf16.mxu1 %v3296_v0 }
0x1fa0   :  { %v1908_v23 = vpop.f32.mrb[18].mxu1 }
0x1fa1   :  { %v1913_v24 = vrot.slane %v1908_v23, 2  ;;  %v2922_v25 = vpop.f32.mrb[19].mxu1 }
0x1fa3   :  { %v1915_v28 = vadd.f32 %v1913_v24, %v3632_v50 }
0x1fa5   :  { %3152 = vtanh.f32 %v1915_v28  ;;  %v2726_v44 = vmul.f32 -1.442695, %v1915_v28 }
0x1fa7   :  { %3154 = vpow2.f32 %v2726_v44 }
0x1faf   :  { %v3153_v32 = vpop.eup %3152 }
0x1fb0   :  { %1930 = vrot.lane.b32.xlu0 %v3153_v32, %s3299_s4 }
0x1fb1   :  { %v3155_v34 = vpop.eup %3154 }
0x1fb2   :  { %v1919_v35 = vadd.f32 1.0, %v3155_v34 }
0x1fb4   :  { %3156 = vrcp.f32 %v1919_v35 }
0x1fbe   :  { %v3157_v36 = vpop.eup %3156 }
0x1fbf   :  { %v1928_v40 = vmul.f32 %v3157_v36, %v1926_v27 }
0x2022   :  { %v1931_v37 = vpop.permute.xlu0 %1930 }
0x2023   :  { %v1933_v38 = vmul.f32 %v3157_v36, %v1931_v37 }
0x2025   :  { %1935 = vrot.lane.b32.xlu0 %v1933_v38, %s3300_s5 }
0x2029   :  { %1946 = vrot.lane.b32.xlu0 %v1945_v39, %s3304_s20 }
0x2097   :  { %v1936_v50 = vpop.permute.xlu0 %1935 }
0x2098   :  { %v1938_v41 = vadd.f32 %v1936_v50, %v1928_v40 }
0x209a   :  { %3158 = vtanh.f32 %v1938_v41  ;;  %v1959_v30 = vsub.f32 %v1938_v41, %v1926_v27 }
0x209b   :  { %v1947_v43 = vpop.permute.xlu0 %1946 }
0x209c   :  { %1961 = vrot.lane.b32.xlu0 %v1959_v30, %s3301_s15 }
0x20a4   :  { %v3159_v42 = vpop.eup %3158 }
0x20a5   :  { %1941 = vrot.lane.b32.xlu1 %v3159_v42, %s3302_s7 }
0x210e   :  { %v1962_v45 = vpop.permute.xlu0 %1961 }
0x210f   :  { %v1964_v48 = vmul.f32 %v3194_v47, %v1962_v45 }
0x2111   :  { %v1966_v49 = vrot.slane %v1964_v48, 6 }
0x2113   :  { %v1968_v53 = vadd.f32 %v1966_v49, %v1838_v14 }
0x2115   :  { %2056 = vrot.lane.b32.xlu0 %v1968_v53, %s3300_s5 }
0x2117   :  { %v1942_v56 = vpop.permute.xlu1 %1941 }
0x2118   :  { %v1944_v57 = vmul.f32 %v3157_v36, %v1942_v56 }
0x211a   :  { %v1949_v58 = vsub.f32 %v1944_v57, %v1947_v43 }
0x211c   :  { %1951 = vrot.lane.b32.xlu1 %v1949_v58, %s3303_s17 }
0x2187   :  { %v2057_v31 = vpop.permute.xlu0 %2056 }
0x218e   :  { %v1952_v59 = vpop.permute.xlu1 %1951 }
0x218f   :  { %v1954_v60 = vmul.f32 %v3194_v47, %v1952_v59 }
0x2191   :  { %v1956_v61 = vrot.slane %v1954_v60, 6 }
0x2193   :  { %v1958_v62 = vadd.f32 %v1956_v61, %v1828_v22 }
0x2195   :  { %2928 = vmatmul.mubr.msk.f32.vlgmr.msra.gmra.mrb[12].mxu0 %vm79_vm1, %v1958_v62 }
0x2196   :  { %3030 = vmatpush3.bf16.msra.mxu0 %v3610_v33  ;;  %2941 = vmatprep.mubr.msk.f32.mxu0 %vm3297_vm0, %v3298_v1 }
0x2197   :  { %3034 = vmatprep.subr.bf16.mxu0 %v3296_v0 }
0x2268   :  { %v2043_v63 = vpop.f32.mrb[12].mxu0 }
0x2269   :  { %v2047_v2 = vadd.f32 %v2043_v63, %v3636_v54  ;;  %v2929_v3 = vpop.f32.mrb[13].mxu0 }
0x226b   :  { %3160 = vtanh.f32 %v2047_v2  ;;  %v2728_v11 = vmul.f32 -1.442695, %v2047_v2 }
0x226d   :  { %3162 = vpow2.f32 %v2728_v11 }
0x2275   :  { %v3161_v4 = vpop.eup %3160 }
0x2276   :  { %2061 = vrot.lane.b32.xlu1 %v3161_v4, %s3299_s4 }
0x2277   :  { %v3163_v5 = vpop.eup %3162 }
0x2278   :  { %v2051_v52 = vadd.f32 1.0, %v3163_v5 }
0x227a   :  { %3164 = vrcp.f32 %v2051_v52 }
0x2284   :  { %v3165_v6 = vpop.eup %3164 }
0x2285   :  { %v2059_v9 = vmul.f32 %v3165_v6, %v2057_v31 }
0x22e8   :  { %v2062_v7 = vpop.permute.xlu1 %2061 }
0x22e9   :  { %v2064_v8 = vmul.f32 %v3165_v6, %v2062_v7 }
0x22eb   :  { %2066 = vrot.lane.b32.xlu1 %v2064_v8, %s3300_s5 }
0x22ef   :  { %2076 = vrot.lane.b32.xlu1 %v1958_v62, %s3304_s20 }
0x235d   :  { %v2067_v12 = vpop.permute.xlu1 %2066 }
0x235e   :  { %v2069_v13 = vadd.f32 %v2067_v12, %v2059_v9 }
0x2360   :  { %3166 = vtanh.f32 %v2069_v13  ;;  %v2086_v14 = vsub.f32 %v2069_v13, %v2057_v31 }
0x2361   :  { %v2077_v16 = vpop.permute.xlu1 %2076 }
0x2362   :  { %2088 = vrot.lane.b32.xlu1 %v2086_v14, %s3301_s15 }
0x236a   :  { %v3167_v15 = vpop.eup %3166 }
0x236b   :  { %2072 = vrot.lane.b32.xlu0 %v3167_v15, %s3302_s7 }
0x23d4   :  { %v2089_v17 = vpop.permute.xlu1 %2088 }
0x23d5   :  { %v2091_v18 = vmul.f32 %v2089_v17, %v3540_v46 }
0x23d7   :  { %v2092_v19 = vadd.f32 %v2091_v18, %v1968_v53 }
0x23d9   :  { %v2182_v20 = vrot.slane %v2092_v19, 6 }
0x23db   :  { %2183 = vrot.lane.b32.xlu1 %v2182_v20, %s3300_s5 }
0x23dd   :  { %v2073_v21 = vpop.permute.xlu0 %2072 }
0x23de   :  { %v2075_v22 = vmul.f32 %v3165_v6, %v2073_v21 }
0x23e0   :  { %v2079_v23 = vsub.f32 %v2075_v22, %v2077_v16 }
0x23e2   :  { %2081 = vrot.lane.b32.xlu0 %v2079_v23, %s3303_s17 }
0x244d   :  { %v2184_v41 = vpop.permute.xlu1 %2183 }
0x2454   :  { %v2082_v24 = vpop.permute.xlu0 %2081 }
0x2455   :  { %v2084_v25 = vmul.f32 %v2082_v24, %v3540_v46 }
0x2457   :  { %v2085_v28 = vadd.f32 %v2084_v25, %v1958_v62 }
0x2459   :  { %2935 = vmatmul.mubr.msk.f32.vlgmr.msra.gmra.mrb[20].mxu1 %vm79_vm1, %v2085_v28  ;;  %v2203_v50 = vrot.slane %v2085_v28, 6 }
0x245a   :  { %3033 = vmatpush3.bf16.msra.mxu1 %v3610_v33  ;;  %2948 = vmatprep.mubr.msk.f32.mxu1 %vm3297_vm0, %v3298_v1 }
0x252c   :  { %v2166_v32 = vpop.f32.mrb[20].mxu1 }
0x252d   :  { %v2171_v44 = vrot.slane %v2166_v32, 6  ;;  %v2936_v34 = vpop.f32.mrb[21].mxu1 }
0x252f   :  { %v2173_v35 = vadd.f32 %v2171_v44, %v3638_v55 }
0x2531   :  { %3168 = vtanh.f32 %v2173_v35  ;;  %v2730_v37 = vmul.f32 -1.442695, %v2173_v35 }
0x2533   :  { %3170 = vpow2.f32 %v2730_v37 }
0x253b   :  { %v3169_v36 = vpop.eup %3168 }
0x253c   :  { %2188 = vrot.lane.b32.xlu0 %v3169_v36, %s3299_s4 }
0x253d   :  { %v3171_v38 = vpop.eup %3170 }
0x253e   :  { %v2177_v39 = vadd.f32 1.0, %v3171_v38 }
0x2540   :  { %3172 = vrcp.f32 %v2177_v39 }
0x254a   :  { %v3173_v27 = vpop.eup %3172 }
0x254b   :  { %v2186_v30 = vmul.f32 %v3173_v27, %v2184_v41 }
0x25ae   :  { %v2189_v40 = vpop.permute.xlu0 %2188 }
0x25af   :  { %v2191_v33 = vmul.f32 %v3173_v27, %v2189_v40 }
0x25b1   :  { %2193 = vrot.lane.b32.xlu0 %v2191_v33, %s3300_s5 }
0x25b5   :  { %2204 = vrot.lane.b32.xlu0 %v2203_v50, %s3304_s20 }
0x2623   :  { %v2194_v42 = vpop.permute.xlu0 %2193 }
0x2624   :  { %v2196_v43 = vadd.f32 %v2194_v42, %v2186_v30 }
0x2626   :  { %3174 = vtanh.f32 %v2196_v43  ;;  %v2217_v45 = vsub.f32 %v2196_v43, %v2184_v41 }
0x2627   :  { %v2205_v48 = vpop.permute.xlu0 %2204 }
0x2628   :  { %2219 = vrot.lane.b32.xlu0 %v2217_v45, %s3301_s15 }
0x2630   :  { %v3175_v47 = vpop.eup %3174 }
0x2631   :  { %2199 = vrot.lane.b32.xlu1 %v3175_v47, %s3302_s7 }
0x269a   :  { %v2220_v49 = vpop.permute.xlu0 %2219 }
0x269b   :  { %v2222_v53 = vmul.f32 %v2220_v49, %v3540_v46 }
0x269d   :  { %v2224_v56 = vrot.slane %v2222_v53, 2 }
0x269f   :  { %v2226_v57 = vadd.f32 %v2224_v56, %v2092_v19  ;;  %v1280_v56 = vsub.f32 %v3588_v10, %v3585_v29  ;;  %v2546_v10 = vld [vmem:[%s3842_s10] sm:$0xff] }
0x26a1   :  { %v2312_v58 = vrot.slane %v2226_v57, 4 }
0x26a3   :  { %2313 = vrot.lane.b32.xlu0 %v2312_v58, %s3300_s5  ;;  %v2200_v59 = vpop.permute.xlu1 %2199 }
0x26a4   :  { %v2202_v60 = vmul.f32 %v3173_v27, %v2200_v59  ;;  %v3195_v59 = vld [vmem:[%s3833_s1 + $0x8] sm:$0xff] }
0x26a6   :  { %v2207_v61 = vsub.f32 %v2202_v60, %v2205_v48 }
0x26a8   :  { %2209 = vrot.lane.b32.xlu1 %v2207_v61, %s3303_s17 }
0x2715   :  { %v2314_v14 = vpop.permute.xlu0 %2313 }
0x271a   :  { %v2210_v62 = vpop.permute.xlu1 %2209 }
0x271b   :  { %v2212_v63 = vmul.f32 %v2210_v62, %v3540_v46 }
0x271d   :  { %v2214_v2 = vrot.slane %v2212_v63, 2 }
0x271f   :  { %v2216_v3 = vadd.f32 %v2214_v2, %v2085_v28 }
0x2721   :  { %2942 = vmatmul.mubr.msk.f32.vlgmr.msra.gmra.mrb[14].mxu0 %vm79_vm1, %v2216_v3 }
0x2722   :  { %2967 = vmatprep.mubr.msk.f32.mxu0 %vm3297_vm0, %v3298_v1  ;;  %v2333_v1 = vrot.slane %v2216_v3, 4 }
0x27f4   :  { %v2296_v4 = vpop.f32.mrb[14].mxu0 }
0x27f5   :  { %v2301_v11 = vrot.slane %v2296_v4, 4  ;;  %v2943_v5 = vpop.f32.mrb[15].mxu0 }
0x27f7   :  { %v2303_v52 = vadd.f32 %v2301_v11, %v3636_v54 }
0x27f9   :  { %3176 = vtanh.f32 %v2303_v52  ;;  %v2732_v7 = vmul.f32 -1.442695, %v2303_v52 }
0x27fb   :  { %3178 = vpow2.f32 %v2732_v7 }
0x2803   :  { %v3177_v6 = vpop.eup %3176 }
0x2804   :  { %2318 = vrot.lane.b32.xlu1 %v3177_v6, %s3299_s4  ;;  %v2548_v6 = vld [vmem:[%s3842_s10 + $0x10] sm:$0xff] }
0x2805   :  { %v3179_v8 = vpop.eup %3178 }
0x2806   :  { %v2307_v31 = vadd.f32 1.0, %v3179_v8 }
0x2808   :  { %3180 = vrcp.f32 %v2307_v31  ;;  %v2550_v31 = vld [vmem:[%s3842_s10 + $0x20] sm:$0xff] }
0x2812   :  { %v3181_v9 = vpop.eup %3180 }
0x2813   :  { %v2316_v15 = vmul.f32 %v3181_v9, %v2314_v14 }
0x2876   :  { %v2319_v12 = vpop.permute.xlu1 %2318 }
0x2877   :  { %v2321_v13 = vmul.f32 %v3181_v9, %v2319_v12 }
0x2879   :  { %2323 = vrot.lane.b32.xlu1 %v2321_v13, %s3300_s5 }
0x287d   :  { %2334 = vrot.lane.b32.xlu1 %v2333_v1, %s3304_s20  ;;  %v2552_v1 = vld [vmem:[%s3842_s10 + $0x30] sm:$0xff] }
0x28eb   :  { %v2324_v54 = vpop.permute.xlu1 %2323 }
0x28ec   :  { %v2326_v16 = vadd.f32 %v2324_v54, %v2316_v15 }
0x28ee   :  { %3182 = vtanh.f32 %v2326_v16  ;;  %v2347_v17 = vsub.f32 %v2326_v16, %v2314_v14  ;;  %v2553_v14 = vld [vmem:[%s3842_s10 + $0x38] sm:$0xff] }
0x28ef   :  { %v2335_v19 = vpop.permute.xlu1 %2334  ;;  %v3044_v54 = vpack.c.bf16 %v2553_v14, %v2552_v1 }
0x28f0   :  { %2349 = vrot.lane.b32.xlu1 %v2347_v17, %s3301_s15 }
0x28f8   :  { %v3183_v18 = vpop.eup %3182 }
0x28f9   :  { %2329 = vrot.lane.b32.xlu0 %v3183_v18, %s3302_s7 }
0x2962   :  { %v2350_v20 = vpop.permute.xlu1 %2349 }
0x2963   :  { %v2352_v21 = vmul.f32 %v2350_v20, %v3540_v46 }
0x2965   :  { %v2354_v22 = vrot.slane %v2352_v21, 4 }
0x2967   :  { %v2356_v23 = vadd.f32 %v2354_v22, %v2226_v57 }
0x2969   :  { %v2442_v24 = vrot.slane %v2356_v23, 2 }
0x296b   :  { %2443 = vrot.lane.b32.xlu1 %v2442_v24, %s3300_s5  ;;  %v2330_v25 = vpop.permute.xlu0 %2329 }
0x296c   :  { %v2332_v28 = vmul.f32 %v3181_v9, %v2330_v25  ;;  %v2551_v9 = vld [vmem:[%s3842_s10 + $0x28] sm:$0xff] }
0x296d   :  { %v3041_v13 = vpack.c.bf16 %v2551_v9, %v2550_v31 }
0x296e   :  { %v2337_v32 = vsub.f32 %v2332_v28, %v2335_v19 }
0x2970   :  { %2339 = vrot.lane.b32.xlu0 %v2337_v32, %s3303_s17  ;;  %v2735_v32 = vld [vmem:[%s3843_s11] ss:$0 sm:$0xff]  ;;  %s3306_s11 = smov [#allocation9]  }
0x29dd   :  { %v2444_v45 = vpop.permute.xlu1 %2443 }
0x29e2   :  { %v2340_v44 = vpop.permute.xlu0 %2339 }
0x29e3   :  { %v2342_v34 = vmul.f32 %v2340_v44, %v3540_v46 }
0x29e5   :  { %v2344_v35 = vrot.slane %v2342_v34, 4 }
0x29e7   :  { %v3737_v36 = vadd.f32 %v2344_v35, %v2216_v3 }
0x29e9   :  { %2949 = vmatmul.mubr.msk.f32.vlgmr.msra.gmra.mrb[22].mxu1 %vm79_vm1, %v3737_v36  ;;  %v2463_v43 = vrot.slane %v3737_v36, 2 }
0x2abc   :  { %v2426_v37 = vpop.f32.mrb[22].mxu1 }
0x2abd   :  { %v2431_v38 = vrot.slane %v2426_v37, 2  ;;  %v2950_v39 = vpop.f32.mrb[23].mxu1 }
0x2abf   :  { %v2433_v27 = vadd.f32 %v2431_v38, %v3638_v55 }
0x2ac1   :  { %3184 = vtanh.f32 %v2433_v27  ;;  %v2734_v33 = vmul.f32 -1.442695, %v2433_v27 }
0x2ac3   :  { %3186 = vpow2.f32 %v2734_v33 }
0x2acb   :  { %v3185_v40 = vpop.eup %3184 }
0x2acc   :  { %2448 = vrot.lane.b32.xlu0 %v3185_v40, %s3299_s4 }
0x2acd   :  { %v3187_v50 = vpop.eup %3186 }
0x2ace   :  { %v2437_v41 = vadd.f32 1.0, %v3187_v50 }
0x2ad0   :  { %3188 = vrcp.f32 %v2437_v41 }
0x2ada   :  { %v3189_v46 = vpop.eup %3188 }
0x2adb   :  { %v2446_v55 = vmul.f32 %v3189_v46, %v2444_v45 }
0x2b3e   :  { %v2449_v30 = vpop.permute.xlu0 %2448 }
0x2b3f   :  { %v2451_v42 = vmul.f32 %v3189_v46, %v2449_v30 }
0x2b41   :  { %2453 = vrot.lane.b32.xlu0 %v2451_v42, %s3300_s5 }
0x2b45   :  { %2464 = vrot.lane.b32.xlu0 %v2463_v43, %s3304_s20 }
0x2bb3   :  { %v2454_v47 = vpop.permute.xlu0 %2453 }
0x2bb4   :  { %v2456_v48 = vadd.f32 %v2454_v47, %v2446_v55 }
0x2bb6   :  { %3190 = vtanh.f32 %v2456_v48  ;;  %v2477_v49 = vsub.f32 %v2456_v48, %v2444_v45 }
0x2bb7   :  { %v2465_v57 = vpop.permute.xlu0 %2464 }
0x2bb8   :  { %2479 = vrot.lane.b32.xlu0 %v2477_v49, %s3301_s15 }
0x2bc0   :  { %v3191_v53 = vpop.eup %3190 }
0x2bc1   :  { %2459 = vrot.lane.b32.xlu1 %v3191_v53, %s3302_s7 }
0x2bc5   :  { %1282 = vrot.lane.b32.xlu1 %v1280_v56, %s3301_s15 }
0x2c2a   :  { %v2480_v58 = vpop.permute.xlu0 %2479 }
0x2c2b   :  { %v2482_v60 = vmul.f32 %v3195_v59, %v2480_v58 }
0x2c2d   :  { %v2484_v63 = vrot.slane %v2482_v60, 6 }
0x2c2f   :  { %v2486_v11 = vadd.f32 %v2484_v63, %v2356_v23 }
0x2c33   :  { %v2460_v61 = vpop.permute.xlu1 %2459 }
0x2c34   :  { %v2462_v62 = vmul.f32 %v3189_v46, %v2460_v61 }
0x2c36   :  { %v2467_v2 = vsub.f32 %v2462_v62, %v2465_v57 }
0x2c37   :  { %v1283_v3 = vpop.permute.xlu1 %1282 }
0x2c38   :  { %v1285_v4 = vmul.f32 %v3195_v59, %v1283_v3  ;;  %2469 = vrot.lane.b32.xlu1 %v2467_v2, %s3303_s17 }
0x2c3a   :  { %v1287_v5 = vrot.slane %v1285_v4, 6 }
0x2c3c   :  { %v1289_v29 = vadd.f32 %v1287_v5, %v3572_v51  ;;  %2522 = vrot.lane.b32.xlu1 %v2486_v11, %s3302_s7  ;;  %v2547_v51 = vld [vmem:[%s3842_s10 + $0x8] sm:$0xff] }
0x2c3d   :  { %v3035_v52 = vpack.c.bf16 %v2547_v51, %v2546_v10 }
0x2c3e   :  { %2490 = vrot.lane.b32.xlu0 %v1289_v29, %s3302_s7 }
0x2c3f   :  { %3036 = vmatpush3.bf16.msra.mxu0 %v3035_v52 }
0x2c40   :  { %2531 = vrot.lane.b32.xlu1 %v2486_v11, %s3305_s29  ;;  %3037 = vmatprep.subr.bf16.mxu0 %v3296_v0 }
0x2c42   :  { %2496 = vrot.lane.b32.xlu0 %v3602_v26, %s3294_s19 }
0x2c46   :  { %2501 = vrot.lane.b32.xlu0 %v1289_v29, %s3305_s29 }
0x2c4a   :  { %2510 = vrot.lane.b32.xlu0 %v3602_v26, %s3300_s5  ;;  %v2549_v26 = vld [vmem:[%s3842_s10 + $0x18] sm:$0xff] }
0x2c4b   :  { %v3038_v7 = vpack.c.bf16 %v2549_v26, %v2548_v6 }
0x2c4d   :  { %3039 = vmatpush3.bf16.msra.mxu0 %v3038_v7 }
0x2c4e   :  { %2515 = vrot.lane.b32.xlu0 %v1289_v29, %s3304_s20  ;;  %3040 = vmatprep.subr.bf16.mxu0 %v3296_v0 }
0x2c51   :  { %3042 = vmatpush3.bf16.msra.mxu0 %v3041_v13 }
0x2c52   :  { %3043 = vmatprep.subr.bf16.mxu0 %v3296_v0 }
0x2c55   :  { %3045 = vmatpush3.bf16.msra.mxu0 %v3044_v54 }
0x2caa   :  { %v2470_v8 = vpop.permute.xlu1 %2469 }
0x2cab   :  { %v2472_v12 = vmul.f32 %v3195_v59, %v2470_v8 }
0x2cad   :  { %v2474_v15 = vrot.slane %v2472_v12, 6 }
0x2cae   :  { %v2523_v18 = vpop.permute.xlu1 %2522 }
0x2caf   :  { %v2476_v16 = vadd.f32 %v2474_v15, %v3737_v36 }
0x2cb0   :  { %v2491_v17 = vpop.permute.xlu0 %2490 }
0x2cb1   :  { %2520 = vst.msk [vmem:[#allocation3 + $0x1] sm:$0x1] %vm2487_vm4, %v2476_v16  ;;  %2527 = vrot.lane.b32.xlu1 %v2476_v16, %s3294_s19 }
0x2cb2   :  { %2494 = vst.msk [vmem:[#allocation3] sm:$0x1] %vm2493_vm5, %v2491_v17  ;;  %2525 = vst.msk [vmem:[#allocation3 + $0x1] sm:$0x1] %vm2493_vm5, %v2523_v18  ;;  %v2532_v22 = vpop.permute.xlu1 %2531 }
0x2cb4   :  { %v2497_v19 = vpop.permute.xlu0 %2496 }
0x2cb5   :  { %2500 = vst.msk [vmem:[#allocation3 - $0x1] sm:$0x2] %vm2499_vm6, %v2497_v19  ;;  %2537 = vrot.lane.b32.xlu1 %v2476_v16, %s3300_s5 }
0x2cb8   :  { %v2502_v0 = vpop.permute.xlu0 %2501 }
0x2cb9   :  { %2505 = vst.msk [vmem:[#allocation3 - $0x1] sm:$0x2] %vm2504_vm7, %v2502_v0  ;;  %2541 = vrot.lane.b32.xlu1 %v2486_v11, %s3304_s20  ;;  %s2671_s20 = sshll.u32 %s3306_s11, 4  ;;  %s2672_s20 = int_to_ptr.vmem [resolvable:$true] %s2671_s20 }
0x2cba   :  { %2507 = vst.msk [vmem:[#allocation3] sm:$0x1] %vm2506_vm8, %v2497_v19  ;;  %s3240_s6 = scalar_lea.vmem %s2672_s20, 32  ;;  %p3245_p3 = scmp.lt.s32.totalorder %s2672_s20, %s2672_s20 }
0x2cbb   :  { %2509 = vst.msk [vmem:[#allocation3] sm:$0x1] %vm2508_vm9, %v2502_v0  ;;  %p3241_p2 = scmp.ne.s32.totalorder %s2672_s20, %s3240_s6  ;;  %p3246_p4 = scmp.lt.s32.totalorder %s3240_s6, %s3240_s6 }
0x2cbc   :  { %v2511_v20 = vpop.permute.xlu0 %2510 }
0x2cbd   :  { %2514 = vst.msk [vmem:[#allocation3 - $0x1] sm:$0x2] %vm2513_vm10, %v2511_v20  ;;  %p3247_p5 = por %p3246_p4, %p3245_p3 }
0x2cbf   :  { %p3248_p6 = pnand %p3247_p5, %p3241_p2 }
0x2cc0   :  { %v2516_v21 = vpop.permute.xlu0 %2515 }
0x2cc1   :  { %2519 = vst.msk [vmem:[#allocation3 - $0x1] sm:$0x2] %vm2518_vm11, %v2516_v21 }
0x2d23   :  { %v2528_v23 = vpop.permute.xlu1 %2527 }
0x2d24   :  { %2530 = vst.msk [vmem:[#allocation3] sm:$0x2] %vm2499_vm6, %v2528_v23 }
0x2d25   :  { %2534 = vst.msk [vmem:[#allocation3] sm:$0x2] %vm2504_vm7, %v2532_v22 }
0x2d26   :  { %2535 = vst.msk [vmem:[#allocation3 + $0x1] sm:$0x1] %vm2506_vm8, %v2528_v23 }
0x2d27   :  { %2536 = vst.msk [vmem:[#allocation3 + $0x1] sm:$0x1] %vm2508_vm9, %v2532_v22  ;;  %v2538_v24 = vpop.permute.xlu1 %2537 }
0x2d28   :  { %2540 = vst.msk [vmem:[#allocation3] sm:$0x2] %vm2513_vm10, %v2538_v24 }
0x2d2b   :  { %v2542_v25 = vpop.permute.xlu1 %2541 }
0x2d2c   :  { %2544 = vst.msk [vmem:[#allocation3] sm:$0x2] %vm2518_vm11, %v2542_v25 }
0x2d33   :  { %v2545_v28 = vld [vmem:[#allocation3] sm:$0x3] }
0x2d34   :  { %2968 = vmatmul.mubr.msk.f32.vlgmr.msra.gmra.mrb[16].mxu0 %vm2561_vm12, %v2545_v28 }
0x2e07   :  { %v2631_v44 = vpop.f32.mrb[16].mxu0 }
0x2e08   :  { %v2632_v34 = vadd.f32 %v2735_v32, %v2631_v44  ;;  %v2969_v35 = vpop.f32.mrb[17].mxu0 }
0x2e0a   :  { %v2641_v36 = vmul.f32 %v2632_v34, %v2632_v34  ;;  %2636 = vst.msk [vmem:[#allocation9] sm:$0x3] %vm2635_vm13, %v2632_v34  ;;  %v2637_v37 = vmul.f32 1.442695, %v2632_v34 }
0x2e0c   :  { %2643 = vrot.lane.b32.xlu0 %v2641_v36, %s3300_s5  ;;  %3192 = vpow2.f32 %v2637_v37 }
0x2e16   :  { %v3193_v38 = vpop.eup %3192 }
0x2e17   :  { %v2639_v39 = vsub.f32 %v3193_v38, %v2632_v34 }
0x2e19   :  { %v2737_v27 = vadd.f32 -1.0, %v2639_v39 }
0x2e7e   :  { %v2644_v40 = vpop.permute.xlu0 %2643 }
0x2e7f   :  { %v2646_v33 = vadd.f32 %v2737_v27, %v2644_v40 }
0x2e81   :  { %2648 = vrot.lane.b32.xlu1 %v2646_v33, %s3301_s15 }
0x2ef3   :  { %v2649_v50 = vpop.permute.xlu1 %2648 }
0x2ef4   :  { %v2651_v41 = vsel %vm2635_vm13, %v2649_v50, 0.0 }
0x2ef5   :  { %2652 = vadd.xlane.f32.xlu0 %v2651_v41 }
0x2ef6   :  { %3251 = shalt.err (!%p3248_p6)
}
0x2ef7   :  { %s3252_s9 = scalar_lea.hbm %s3844_s12, 32 }
0x2ef8   :  { %p3253_p7 = scmp.ne.s32.totalorder %s3844_s12, %s3252_s9  ;;  %p3256_p8 = scmp.lt.u32.totalorder %s3252_s9, %s3844_s12 }
0x2efa   :  { %p3258_p9 = pnand %p3256_p8, %p3253_p7 }
0x2efc   :  { %3261 = shalt.err (!%p3258_p9)
}
0x2efd   :  { %2674 = dma.vmem_to_hbm [thread:$0]  %s2672_s20, 32, %s3844_s12, [#allocation6]   ;;  %vm2663_vm14 = vcmask 0  }
0x2efe   :  { %s3307_s30 = smov [#allocation10]  }
0x2eff   :  { %s2681_s14 = sshll.u32 %s3307_s30, 4  ;;  %s2682_s14 = int_to_ptr.vmem [resolvable:$true] %s2681_s14 }
0x2f00   :  { %s3262_s4 = scalar_lea.vmem %s2682_s14, 16  ;;  %s3266_s7 = scalar_lea.vmem %s2682_s14, 32 }
0x2f01   :  { %p3263_p10 = scmp.ne.s32.totalorder %s2682_s14, %s3262_s4  ;;  %p3267_p11 = scmp.lt.s32.totalorder %s2682_s14, %s2682_s14 }
0x2f02   :  { %p3268_p12 = scmp.lt.s32.totalorder %s3266_s7, %s3262_s4 }
0x2f04   :  { %p3269_p13 = por %p3268_p12, %p3267_p11 }
0x2f06   :  { %p3270_p0 = pnand %p3269_p13, %p3263_p10 }
0x2f82   :  { %v2653_v46 = vpop.xlane.xlu0 %2652 }
0x2f83   :  { %v2654_v30 = vrot.slane %v2653_v46, 4 }
0x2f85   :  { %v2655_v42 = vadd.f32 %v2654_v30, %v2653_v46 }
0x2f87   :  { %v2656_v43 = vrot.slane %v2655_v42, 2 }
0x2f89   :  { %v2657_v45 = vadd.f32 %v2656_v43, %v2655_v42 }
0x2f8b   :  { %v2658_v55 = vrot.slane %v2657_v45, 1 }
0x2f8d   :  { %v2659_v47 = vadd.f32 %v2658_v55, %v2657_v45 }
0x2f8f   :  { %3046 = vpush %v2659_v47 }
0x2fc0   :  { %s3047_s0 = spop %3046 }
0x2fc1   :  { %s2661_s3 = smul.f32 0.5, %s3047_s0 }
0x2fc3   :  { %v2662_v48 = vstv %s2661_s3 }
0x2fc4   :  { %2664 = vst.msk [vmem:[#allocation10] sm:$0x1] %vm2663_vm14, %v2662_v48 }
0x2fc5   :  { %3273 = shalt.err (!%p3270_p0)
}
0x2fc6   :  { %s3274_s16 = scalar_lea.hbm %s3845_s13, 16 }
0x2fc7   :  { %p3275_p1 = scmp.ne.s32.totalorder %s3845_s13, %s3274_s16  ;;  %p3278_p2 = scmp.lt.u32.totalorder %s3274_s16, %s3845_s13 }
0x2fc9   :  { %p3280_p3 = pnand %p3278_p2, %p3275_p1 }
0x2fcb   :  { %3283 = shalt.err (!%p3280_p3)
}
0x2fcc   :  { %2684 = dma.vmem_to_hbm [thread:$0]  %s2682_s14, 16, %s3845_s13, [#allocation11]  }
0x2fcd   :  { %3288 = dma.done.wait [#allocation6], 32  }
0x2fce   :  { %3289 = vsyncadd [#allocation6], 4294967264 }
0x2fcf   :  { %3290 = dma.done.wait [#allocation11], 16  }
0x2fd0   :  { %3291 = vsyncadd [#allocation11], 4294967280 }
0x2fd1   :  { %2691 = vsyncpa [#allocation5], 1 }
0x2fd2   :  { %2692 = vsyncpa [#allocation8], 1 }
0x2fd3   :  { %2693 = vsyncpa [#allocation6], 1 }
0x2fd4   :  { %2694 = vsyncpa [#allocation11], 1 }

</bundles_post_ra>
